<compile_context>
chip_gen: v7x
topology: tpu7x:2x2x1
jax: 0.10.0
libtpu: 0.0.40
codegen_flags: <defaults>
</compile_context>

<pallas_src>
import functools
import jax
import jax.numpy as jnp
from jax.experimental import pallas as pl
from jax.experimental.pallas import tpu as pltpu

EPS = 1e-6          # LayerNormalization eps
NEG_INF = -1e9      # masked_fill value (matches PyTorch reference)


def _row_tile(t):
    """Largest friendly row tile dividing t (256 preferred for v7x VMEM)."""
    for cand in (256, 512, 128):
        if t % cand == 0:
            return cand
    return t


def _vmem_limit(bytes_blocks, bytes_scratch, bytes_live):
    """Scoped VMEM budget from the real footprint (inputs/outputs double-buffered)."""
    est = 2 * bytes_blocks + bytes_scratch + bytes_live
    est = int(1.25 * est) + (4 << 20)          # compiler temporaries headroom
    # Cap keeps the request valid on v7x (64 MiB/TC); raise toward ~100 MiB when
    # targeting v5e/v6e (128 MiB parts) at production shapes.
    return max(32 << 20, min(est, 56 << 20))


def _layernorm_f32(x, alpha, beta):
    """alpha * (x - mean) / (std + eps) + beta with torch.std (unbiased) semantics."""
    d = x.shape[-1]
    mean = jnp.mean(x, axis=-1, keepdims=True)
    var = jnp.sum((x - mean) ** 2, axis=-1, keepdims=True) / (d - 1)
    return alpha * (x - mean) / (jnp.sqrt(var) + EPS) + beta


def _attention_heads(q_bf, k_ref, v_ref, is_masked, wo_ref, head_count, dk):
    """Per-head attention with accumulated output projection.

    q_bf: (tq, D) bf16 (already scaled by 1/sqrt(dk)); k_ref/v_ref: (H, Tk, dk)
    bf16 scratch; is_masked: (tq, Tk) bool; wo_ref: (D, D) bf16.
    Only one head's (tq, Tk) score block is live at a time.
    """
    tq, D = q_bf.shape
    out = jnp.zeros((tq, D), jnp.float32)
    for h in range(head_count):
        lo = h * dk
        qh = q_bf[:, lo:lo + dk]                                   # (tq, dk) bf16
        kh = k_ref[h]                                              # (Tk, dk) bf16
        vh = v_ref[h]                                              # (Tk, dk) bf16
        s = jax.lax.dot_general(qh, kh, (((1,), (1,)), ((), ())),
                                preferred_element_type=jnp.float32)  # (tq, Tk) f32
        s = jnp.where(is_masked, jnp.float32(NEG_INF), s)
        s = s - jnp.max(s, axis=-1, keepdims=True)
        p = jnp.exp(s)
        p = p * pl.reciprocal(jnp.sum(p, axis=-1, keepdims=True), approx=True)
        ctx = jnp.dot(p.astype(jnp.bfloat16), vh,
                      preferred_element_type=jnp.float32)          # (tq, dk) f32
        out = out + jnp.dot(ctx.astype(jnp.bfloat16), wo_ref[lo:lo + dk, :],
                            preferred_element_type=jnp.float32)    # (tq, D) f32
    return out
    # TODO(synk): for dk < 128 the per-head contraction underfills the 256-wide
    # MXU on v6e/v7x; packing 2-4 heads per MXU call would raise utilization.


# ----------------------------------------------------------------------------
# Fused residual sub-block kernels
# ----------------------------------------------------------------------------
def self_attn_block_kernel(x_ref, mask_ref, ln_a_ref, ln_b_ref,
                           wq_ref, wkv_ref, wo_ref,
                           o_ref,
                           xn_ref, k_ref, v_ref,
                           *, head_count, q_tile, sm_scale):
    # x = x + self_attn(LN(x), LN(x), LN(x), mask); one q-tile of rows per step.
    q_idx = pl.program_id(1)
    T, D = x_ref.shape[1], x_ref.shape[2]
    dk = D // head_count

    alpha = ln_a_ref[...].astype(jnp.float32)
    beta = ln_b_ref[...].astype(jnp.float32)

    # Once per batch element: LN over full T, fused K/V projection, head-major
    # bf16 K/V kept in persistent scratch for all q-steps of this batch.
    @pl.when(q_idx == 0)
    def _():
        x_all = x_ref[0].astype(jnp.float32)                       # (T, D)
        xn_b = _layernorm_f32(x_all, alpha, beta).astype(jnp.bfloat16)
        xn_ref[...] = xn_b
        kv = jnp.dot(xn_b, wkv_ref[...],
                     preferred_element_type=jnp.float32)           # (T, 2D) f32
        k = kv[:, :D].astype(jnp.bfloat16)
        v = kv[:, D:].astype(jnp.bfloat16)
        for h in range(head_count):
            k_ref[h] = k[:, h * dk:(h + 1) * dk]
            v_ref[h] = v[:, h * dk:(h + 1) * dk]

    q_start = pl.multiple_of(q_idx * q_tile, q_tile)
    x_q = x_ref[0, pl.ds(q_start, q_tile), :].astype(jnp.float32)  # (tq, D) residual
    xn_q = xn_ref[pl.ds(q_start, q_tile), :]                       # (tq, D) bf16 (reused LN)

    q = jnp.dot(xn_q, wq_ref[...], preferred_element_type=jnp.float32)
    q_bf = (q * sm_scale).astype(jnp.bfloat16)                     # scale in f32

    is_masked = mask_ref[0].astype(jnp.int32) == 0                 # (tq, T) bool
    attn = _attention_heads(q_bf, k_ref, v_ref, is_masked, wo_ref, head_count, dk)
    o_ref[0] = (x_q + attn).astype(o_ref.dtype)


def cross_attn_block_kernel(x_ref, enc_ref, mask_ref, ln_a_ref, ln_b_ref,
                            wq_ref, wkv_ref, wo_ref,
                            o_ref,
                            k_ref, v_ref,
                            *, head_count, sm_scale):
    # x = x + cross_attn(LN(x), enc, enc, mask); enc is NOT normalized.
    q_idx = pl.program_id(1)
    Tk, D = enc_ref.shape[1], enc_ref.shape[2]
    dk = D // head_count

    # Once per batch element: K/V from the encoder output.
    @pl.when(q_idx == 0)
    def _():
        enc = enc_ref[0].astype(jnp.bfloat16)                      # (Tk, D)
        kv = jnp.dot(enc, wkv_ref[...], preferred_element_type=jnp.float32)
        k = kv[:, :D].astype(jnp.bfloat16)
        v = kv[:, D:].astype(jnp.bfloat16)
        for h in range(head_count):
            k_ref[h] = k[:, h * dk:(h + 1) * dk]
            v_ref[h] = v[:, h * dk:(h + 1) * dk]

    x_q = x_ref[0].astype(jnp.float32)                             # (tq, D)
    alpha = ln_a_ref[...].astype(jnp.float32)
    beta = ln_b_ref[...].astype(jnp.float32)
    xn_q = _layernorm_f32(x_q, alpha, beta).astype(jnp.bfloat16)

    q = jnp.dot(xn_q, wq_ref[...], preferred_element_type=jnp.float32)
    q_bf = (q * sm_scale).astype(jnp.bfloat16)

    is_masked = mask_ref[0].astype(jnp.int32) == 0                 # (tq, Tk) bool
    attn = _attention_heads(q_bf, k_ref, v_ref, is_masked, wo_ref, head_count, dk)
    o_ref[0] = (x_q + attn).astype(o_ref.dtype)


def ffn_block_kernel(x_ref, ln_a_ref, ln_b_ref, w1_ref, b1_ref, w2_ref, b2_ref,
                     o_ref):
    # x = x + linear2(relu(linear1(LN(x))))
    x = x_ref[0].astype(jnp.float32)                               # (tt, D)
    xn = _layernorm_f32(x, ln_a_ref[...].astype(jnp.float32),
                        ln_b_ref[...].astype(jnp.float32))
    h = jnp.dot(xn.astype(jnp.bfloat16), w1_ref[...],
                preferred_element_type=jnp.float32) + b1_ref[...]
    h = jnp.maximum(h, 0.0)
    o = jnp.dot(h.astype(jnp.bfloat16), w2_ref[...],
                preferred_element_type=jnp.float32) + b2_ref[...]
    o_ref[0] = (x + o).astype(o_ref.dtype)
    # TODO(synk): for very large Dff on v7x, add a Dff grid axis + f32 accumulator
    # so the (D,Dff)/(Dff,D) weights need not be fully resident.


# ----------------------------------------------------------------------------
# Wrappers (one pallas_call per residual sub-block)
# ----------------------------------------------------------------------------
def self_attention_block(x, mask, ln_alpha, ln_bias, wq, wk, wv, wo, head_count):
    B, T, D = x.shape
    assert D % head_count == 0, "d_model not divisible by head_count"
    dk = D // head_count
    tq = _row_tile(T)
    assert T % tq == 0, "row tile must divide sequence length"
    grid = (B, T // tq)

    wq_b = wq.astype(jnp.bfloat16)
    wkv_b = jnp.concatenate([wk, wv], axis=1).astype(jnp.bfloat16)   # (D, 2D)
    wo_b = wo.astype(jnp.bfloat16)
    mask_i8 = mask.astype(jnp.int8)

    itm = x.dtype.itemsize
    blocks = (T * D * itm + tq * T * 1 + 2 * D * 4
              + D * D * 2 + D * 2 * D * 2 + D * D * 2 + tq * D * itm)
    scratch = 3 * T * D * 2                                           # xn + K + V (bf16)
    live = 2 * tq * T * 4 + 8 * tq * D * 4

    kernel = functools.partial(self_attn_block_kernel,
                               head_count=head_count, q_tile=tq,
                               sm_scale=1.0 / (dk ** 0.5))
    return pl.pallas_call(
        kernel,
        out_shape=jax.ShapeDtypeStruct((B, T, D), x.dtype),
        grid=grid,
        in_specs=[
            pl.BlockSpec((1, T, D), lambda b, q: (b, 0, 0)),   # full x, resident across q
            pl.BlockSpec((1, tq, T), lambda b, q: (b, q, 0)),  # int8 mask rows for q-tile
            pl.BlockSpec((1, D), lambda b, q: (0, 0)),
            pl.BlockSpec((1, D), lambda b, q: (0, 0)),
            pl.BlockSpec((D, D), lambda b, q: (0, 0)),
            pl.BlockSpec((D, 2 * D), lambda b, q: (0, 0)),
            pl.BlockSpec((D, D), lambda b, q: (0, 0)),
        ],
        out_specs=pl.BlockSpec((1, tq, D), lambda b, q: (b, q, 0)),
        scratch_shapes=[
            pltpu.VMEM((T, D), jnp.bfloat16),                  # LN(x) reused by all q-tiles
            pltpu.VMEM((head_count, T, dk), jnp.bfloat16),     # K, head-major
            pltpu.VMEM((head_count, T, dk), jnp.bfloat16),     # V, head-major
        ],
        compiler_params=pltpu.CompilerParams(
            dimension_semantics=("parallel", "arbitrary"),
            vmem_limit_bytes=_vmem_limit(blocks, scratch, live)),
    )(x, mask_i8, ln_alpha.reshape(1, D), ln_bias.reshape(1, D),
      wq_b, wkv_b, wo_b)


def cross_attention_block(x, enc, mask, ln_alpha, ln_bias, wq, wk, wv, wo,
                          head_count):
    B, T, D = x.shape
    Tk = enc.shape[1]
    dk = D // head_count
    tq = _row_tile(T)
    assert T % tq == 0, "row tile must divide sequence length"
    grid = (B, T // tq)

    wq_b = wq.astype(jnp.bfloat16)
    wkv_b = jnp.concatenate([wk, wv], axis=1).astype(jnp.bfloat16)   # (D, 2D)
    wo_b = wo.astype(jnp.bfloat16)
    mask_i8 = mask.astype(jnp.int8)

    itm = x.dtype.itemsize
    blocks = (tq * D * itm + Tk * D * enc.dtype.itemsize + tq * Tk * 1
              + 2 * D * 4 + D * D * 2 + D * 2 * D * 2 + D * D * 2 + tq * D * itm)
    scratch = 2 * Tk * D * 2
    live = 2 * tq * Tk * 4 + 8 * tq * D * 4

    kernel = functools.partial(cross_attn_block_kernel,
                               head_count=head_count,
                               sm_scale=1.0 / (dk ** 0.5))
    return pl.pallas_call(
        kernel,
        out_shape=jax.ShapeDtypeStruct((B, T, D), x.dtype),
        grid=grid,
        in_specs=[
            pl.BlockSpec((1, tq, D), lambda b, q: (b, q, 0)),   # decoder stream q-tile
            pl.BlockSpec((1, Tk, D), lambda b, q: (b, 0, 0)),   # encoder out, resident
            pl.BlockSpec((1, tq, Tk), lambda b, q: (b, q, 0)),  # int8 mask
            pl.BlockSpec((1, D), lambda b, q: (0, 0)),
            pl.BlockSpec((1, D), lambda b, q: (0, 0)),
            pl.BlockSpec((D, D), lambda b, q: (0, 0)),
            pl.BlockSpec((D, 2 * D), lambda b, q: (0, 0)),
            pl.BlockSpec((D, D), lambda b, q: (0, 0)),
        ],
        out_specs=pl.BlockSpec((1, tq, D), lambda b, q: (b, q, 0)),
        scratch_shapes=[
            pltpu.VMEM((head_count, Tk, dk), jnp.bfloat16),     # K, head-major
            pltpu.VMEM((head_count, Tk, dk), jnp.bfloat16),     # V, head-major
        ],
        compiler_params=pltpu.CompilerParams(
            dimension_semantics=("parallel", "arbitrary"),
            vmem_limit_bytes=_vmem_limit(blocks, scratch, live)),
    )(x, enc, mask_i8, ln_alpha.reshape(1, D), ln_bias.reshape(1, D),
      wq_b, wkv_b, wo_b)


def ffn_block(x, ln_alpha, ln_bias, w1, b1, w2, b2):
    B, T, D = x.shape
    Dff = w1.shape[1]
    tt = _row_tile(T)
    assert T % tt == 0
    grid = (B, T // tt)

    itm = x.dtype.itemsize
    blocks = (2 * tt * D * itm + 2 * D * 4
              + D * Dff * 2 + Dff * 4 + Dff * D * 2 + D * 4)
    live = 2 * tt * Dff * 4 + 4 * tt * D * 4

    return pl.pallas_call(
        ffn_block_kernel,
        out_shape=jax.ShapeDtypeStruct((B, T, D), x.dtype),
        grid=grid,
        in_specs=[
            pl.BlockSpec((1, tt, D), lambda b, t: (b, t, 0)),
            pl.BlockSpec((1, D), lambda b, t: (0, 0)),
            pl.BlockSpec((1, D), lambda b, t: (0, 0)),
            pl.BlockSpec((D, Dff), lambda b, t: (0, 0)),
            pl.BlockSpec((1, Dff), lambda b, t: (0, 0)),
            pl.BlockSpec((Dff, D), lambda b, t: (0, 0)),
            pl.BlockSpec((1, D), lambda b, t: (0, 0)),
        ],
        out_specs=pl.BlockSpec((1, tt, D), lambda b, t: (b, t, 0)),
        compiler_params=pltpu.CompilerParams(
            dimension_semantics=("parallel", "parallel"),
            vmem_limit_bytes=_vmem_limit(blocks, 0, live)),
    )(x, ln_alpha.reshape(1, D), ln_bias.reshape(1, D),
      w1.astype(jnp.bfloat16), b1.reshape(1, Dff),
      w2.astype(jnp.bfloat16), b2.reshape(1, D))


# ----------------------------------------------------------------------------
# DecoderBlock: three pre-norm residual connections (each fused into 1 kernel)
# ----------------------------------------------------------------------------
def decoder_block(params, x, encoder_output, source_mask, target_mask, head_count):
    x = self_attention_block(x, target_mask,
                             params["ln1_alpha"], params["ln1_bias"],
                             params["sa_wq"], params["sa_wk"],
                             params["sa_wv"], params["sa_wo"], head_count)
    x = cross_attention_block(x, encoder_output, source_mask,
                              params["ln2_alpha"], params["ln2_bias"],
                              params["ca_wq"], params["ca_wk"],
                              params["ca_wv"], params["ca_wo"], head_count)
    x = ffn_block(x, params["ln3_alpha"], params["ln3_bias"],
                  params["ff_w1"], params["ff_b1"],
                  params["ff_w2"], params["ff_b2"])
    return x


def init_params(key, d_model, dff):
    ks = jax.random.split(key, 10)
    scale = 0.02
    return {
        "sa_wq": scale * jax.random.normal(ks[0], (d_model, d_model), jnp.float32),
        "sa_wk": scale * jax.random.normal(ks[1], (d_model, d_model), jnp.float32),
        "sa_wv": scale * jax.random.normal(ks[2], (d_model, d_model), jnp.float32),
        "sa_wo": scale * jax.random.normal(ks[3], (d_model, d_model), jnp.float32),
        "ca_wq": scale * jax.random.normal(ks[4], (d_model, d_model), jnp.float32),
        "ca_wk": scale * jax.random.normal(ks[5], (d_model, d_model), jnp.float32),
        "ca_wv": scale * jax.random.normal(ks[6], (d_model, d_model), jnp.float32),
        "ca_wo": scale * jax.random.normal(ks[7], (d_model, d_model), jnp.float32),
        "ff_w1": scale * jax.random.normal(ks[8], (d_model, dff), jnp.float32),
        "ff_b1": jnp.zeros((dff,), jnp.float32),
        "ff_w2": scale * jax.random.normal(ks[9], (dff, d_model), jnp.float32),
        "ff_b2": jnp.zeros((d_model,), jnp.float32),
        "ln1_alpha": jnp.ones((d_model,), jnp.float32),
        "ln1_bias": jnp.zeros((d_model,), jnp.float32),
        "ln2_alpha": jnp.ones((d_model,), jnp.float32),
        "ln2_bias": jnp.zeros((d_model,), jnp.float32),
        "ln3_alpha": jnp.ones((d_model,), jnp.float32),
        "ln3_bias": jnp.zeros((d_model,), jnp.float32),
    }


# Pure-JAX reference (f32 everywhere) mirroring the PyTorch module.
def reference_decoder_block(params, x, enc, src_mask, tgt_mask, head_count):
    def ln(z, a, b):
        mean = z.mean(-1, keepdims=True)
        var = ((z - mean) ** 2).sum(-1, keepdims=True) / (z.shape[-1] - 1)
        return a * (z - mean) / (jnp.sqrt(var) + EPS) + b

    def mha(q_in, kv_in, mask, wq, wk, wv, wo):
        B, Tq, D = q_in.shape
        Tk = kv_in.shape[1]
        dk = D // head_count
        q = (q_in @ wq).reshape(B, Tq, head_count, dk).transpose(0, 2, 1, 3)
        k = (kv_in @ wk).reshape(B, Tk, head_count, dk).transpose(0, 2, 1, 3)
        v = (kv_in @ wv).reshape(B, Tk, head_count, dk).transpose(0, 2, 1, 3)
        s = (q @ k.transpose(0, 1, 3, 2)) / jnp.sqrt(jnp.float32(dk))
        s = jnp.where(mask[:, None, :, :] == 0, NEG_INF, s)
        p = jax.nn.softmax(s, axis=-1)
        ctx = (p @ v).transpose(0, 2, 1, 3).reshape(B, Tq, D)
        return ctx @ wo

    xn = ln(x, params["ln1_alpha"], params["ln1_bias"])
    x = x + mha(xn, xn, tgt_mask, params["sa_wq"], params["sa_wk"],
                params["sa_wv"], params["sa_wo"])
    xn = ln(x, params["ln2_alpha"], params["ln2_bias"])
    x = x + mha(xn, enc, src_mask, params["ca_wq"], params["ca_wk"],
                params["ca_wv"], params["ca_wo"])
    xn = ln(x, params["ln3_alpha"], params["ln3_bias"])
    h = jnp.maximum(xn @ params["ff_w1"] + params["ff_b1"], 0.0)
    return x + h @ params["ff_w2"] + params["ff_b2"]


if __name__ == "__main__":
    B, Tq, Tk = 2, 8, 8
    d_model, head_count, dff = 32, 4, 64

    key = jax.random.PRNGKey(0)
    kx, kenc, kp = jax.random.split(key, 3)

    x = jax.random.normal(kx, (B, Tq, d_model), jnp.float32)
    encoder_output = jax.random.normal(kenc, (B, Tk, d_model), jnp.float32)

    # causal target mask, all-ones source mask (broadcast over heads)
    target_mask = jnp.tril(jnp.ones((Tq, Tq), jnp.int32))[None].repeat(B, axis=0)
    source_mask = jnp.ones((B, Tq, Tk), jnp.int32)

    params = init_params(kp, d_model, dff)

    fwd = jax.jit(decoder_block, static_argnums=(5,))
    out = fwd(params, x, encoder_output, source_mask, target_mask, head_count)
    out = jax.block_until_ready(out)
    assert out.shape == (B, Tq, d_model)

    ref = reference_decoder_block(params, x, encoder_output,
                                  source_mask, target_mask, head_count)
    err = float(jnp.max(jnp.abs(out - ref)))
    assert err < 2e-2, f"max abs error vs f32 reference too large: {err}"
    print("KERNEL_OK")
</pallas_src>

<mosaic_0001>
module attributes {stable_mosaic.version = 11 : i64} {
  func.func @self_attn_block_kernel(%arg0: i32, %arg1: i32, %arg2: memref<1x8x32xf32, #tpu.memory_space<vmem>>, %arg3: memref<1x8x8xi8, #tpu.memory_space<vmem>>, %arg4: memref<1x32xf32, #tpu.memory_space<vmem>>, %arg5: memref<1x32xf32, #tpu.memory_space<vmem>>, %arg6: memref<32x32xbf16, #tpu.memory_space<vmem>>, %arg7: memref<32x64xbf16, #tpu.memory_space<vmem>>, %arg8: memref<32x32xbf16, #tpu.memory_space<vmem>>, %arg9: memref<1x8x32xf32, #tpu.memory_space<vmem>>, %arg10: memref<8x32xbf16, #tpu.memory_space<vmem>>, %arg11: memref<4x8x8xbf16, #tpu.memory_space<vmem>>, %arg12: memref<4x8x8xbf16, #tpu.memory_space<vmem>>) attributes {dimension_semantics = [#tpu.dimension_semantics<parallel>, #tpu.dimension_semantics<arbitrary>], iteration_bounds = array<i64: 2, 1>, scalar_prefetch = 0 : i64, scratch_operands = 3 : i64, tpu.core_type = #tpu.core_type<tc>, window_params = [{transform_indices = @transform_0, window_bounds = array<i64: 1, 8, 32>}, {transform_indices = @transform_1, window_bounds = array<i64: 1, 8, 8>}, {pipeline_mode = #tpu.pipeline_mode<synchronous>, transform_indices = @transform_2, window_bounds = array<i64: 1, 32>}, {pipeline_mode = #tpu.pipeline_mode<synchronous>, transform_indices = @transform_3, window_bounds = array<i64: 1, 32>}, {pipeline_mode = #tpu.pipeline_mode<synchronous>, transform_indices = @transform_4, window_bounds = array<i64: 32, 32>}, {pipeline_mode = #tpu.pipeline_mode<synchronous>, transform_indices = @transform_5, window_bounds = array<i64: 32, 64>}, {pipeline_mode = #tpu.pipeline_mode<synchronous>, transform_indices = @transform_6, window_bounds = array<i64: 32, 32>}, {transform_indices = @transform_7, window_bounds = array<i64: 1, 8, 32>}]} {
    %c0 = arith.constant 0 : index
    %c0_0 = arith.constant 0 : index
    %0 = vector.load %arg4[%c0, %c0_0] : memref<1x32xf32, #tpu.memory_space<vmem>>, vector<1x32xf32>
    %c0_1 = arith.constant 0 : index
    %c0_2 = arith.constant 0 : index
    %1 = vector.load %arg5[%c0_1, %c0_2] : memref<1x32xf32, #tpu.memory_space<vmem>>, vector<1x32xf32>
    %c0_i32 = arith.constant 0 : i32
    %2 = arith.cmpi eq, %arg1, %c0_i32 : i32
    %3 = arith.extui %2 : i1 to i32
    %c0_i32_3 = arith.constant 0 : i32
    %4 = arith.cmpi ne, %3, %c0_i32_3 : i32
    scf.if %4 {
      %c0_68 = arith.constant 0 : index
      %c0_69 = arith.constant 0 : index
      %c0_70 = arith.constant 0 : index
      %123 = vector.load %arg2[%c0_68, %c0_69, %c0_70] : memref<1x8x32xf32, #tpu.memory_space<vmem>>, vector<1x8x32xf32>
      %124 = vector.shape_cast %123 : vector<1x8x32xf32> to vector<8x32xf32>
      %cst_71 = arith.constant dense<0.000000e+00> : vector<8xf32>
      %125 = vector.multi_reduction <add>, %124, %cst_71 [1] : vector<8x32xf32> to vector<8xf32>
      %126 = vector.shape_cast %125 : vector<8xf32> to vector<8x1xf32>
      %cst_72 = arith.constant 3.200000e+01 : f32
      %127 = vector.broadcast %cst_72 : f32 to vector<8x1xf32>
      %128 = arith.divf %126, %127 : vector<8x1xf32>
      %129 = vector.broadcast %128 : vector<8x1xf32> to vector<8x32xf32>
      %130 = arith.subf %124, %129 : vector<8x32xf32>
      %131 = arith.mulf %130, %130 : vector<8x32xf32>
      %cst_73 = arith.constant dense<0.000000e+00> : vector<8xf32>
      %132 = vector.multi_reduction <add>, %131, %cst_73 [1] : vector<8x32xf32> to vector<8xf32>
      %133 = vector.shape_cast %132 : vector<8xf32> to vector<8x1xf32>
      %cst_74 = arith.constant 3.100000e+01 : f32
      %134 = vector.broadcast %cst_74 : f32 to vector<8x1xf32>
      %135 = arith.divf %133, %134 : vector<8x1xf32>
      %136 = vector.broadcast %128 : vector<8x1xf32> to vector<8x32xf32>
      %137 = arith.subf %124, %136 : vector<8x32xf32>
      %138 = vector.broadcast %0 : vector<1x32xf32> to vector<8x32xf32>
      %139 = arith.mulf %138, %137 : vector<8x32xf32>
      %140 = math.sqrt %135 : vector<8x1xf32>
      %cst_75 = arith.constant 9.99999997E-7 : f32
      %141 = vector.broadcast %cst_75 : f32 to vector<8x1xf32>
      %142 = arith.addf %140, %141 : vector<8x1xf32>
      %143 = vector.broadcast %142 : vector<8x1xf32> to vector<8x32xf32>
      %144 = arith.divf %139, %143 : vector<8x32xf32>
      %145 = vector.broadcast %1 : vector<1x32xf32> to vector<8x32xf32>
      %146 = arith.addf %144, %145 : vector<8x32xf32>
      %147 = arith.truncf %146 : vector<8x32xf32> to vector<8x32xbf16>
      %c0_76 = arith.constant 0 : index
      %c0_77 = arith.constant 0 : index
      %148 = vector.load %arg10[%c0_76, %c0_77] : memref<8x32xbf16, #tpu.memory_space<vmem>>, vector<8x32xbf16>
      tpu.vector_store %arg10[%c0_76, %c0_77], %147 {strides = array<i32>} : memref<8x32xbf16, #tpu.memory_space<vmem>>, vector<8x32xbf16>,
      %c0_78 = arith.constant 0 : index
      %c0_79 = arith.constant 0 : index
      %149 = vector.load %arg7[%c0_78, %c0_79] : memref<32x64xbf16, #tpu.memory_space<vmem>>, vector<32x64xbf16>
      %cst_80 = arith.constant dense<0.000000e+00> : vector<8x64xf32>
      %150 = tpu.matmul %147, %149, %cst_80 {dimension_numbers = #tpu.dot_dimension_numbers<[1], [0], [0], [1], [0, 0, 1, 1], [], []>} : vector<8x32xbf16>, vector<32x64xbf16>, vector<8x64xf32> -> vector<8x64xf32>
      %151 = vector.extract_strided_slice %150 {offsets = [0, 0], sizes = [8, 32], strides = [1, 1]} : vector<8x64xf32> to vector<8x32xf32>
      %152 = arith.truncf %151 : vector<8x32xf32> to vector<8x32xbf16>
      %153 = vector.extract_strided_slice %150 {offsets = [0, 32], sizes = [8, 32], strides = [1, 1]} : vector<8x64xf32> to vector<8x32xf32>
      %154 = arith.truncf %153 : vector<8x32xf32> to vector<8x32xbf16>
      %155 = vector.extract_strided_slice %152 {offsets = [0, 0], sizes = [8, 8], strides = [1, 1]} : vector<8x32xbf16> to vector<8x8xbf16>
      %c0_81 = arith.constant 0 : index
      %c0_82 = arith.constant 0 : index
      %c0_83 = arith.constant 0 : index
      %156 = vector.load %arg11[%c0_81, %c0_82, %c0_83] : memref<4x8x8xbf16, #tpu.memory_space<vmem>>, vector<1x8x8xbf16>
      %157 = vector.shape_cast %156 : vector<1x8x8xbf16> to vector<8x8xbf16>
      %158 = vector.shape_cast %155 : vector<8x8xbf16> to vector<1x8x8xbf16>
      tpu.vector_store %arg11[%c0_81, %c0_82, %c0_83], %158 {strides = array<i32>} : memref<4x8x8xbf16, #tpu.memory_space<vmem>>, vector<1x8x8xbf16>,
      %159 = vector.extract_strided_slice %154 {offsets = [0, 0], sizes = [8, 8], strides = [1, 1]} : vector<8x32xbf16> to vector<8x8xbf16>
      %c0_84 = arith.constant 0 : index
      %c0_85 = arith.constant 0 : index
      %c0_86 = arith.constant 0 : index
      %160 = vector.load %arg12[%c0_84, %c0_85, %c0_86] : memref<4x8x8xbf16, #tpu.memory_space<vmem>>, vector<1x8x8xbf16>
      %161 = vector.shape_cast %160 : vector<1x8x8xbf16> to vector<8x8xbf16>
      %162 = vector.shape_cast %159 : vector<8x8xbf16> to vector<1x8x8xbf16>
      tpu.vector_store %arg12[%c0_84, %c0_85, %c0_86], %162 {strides = array<i32>} : memref<4x8x8xbf16, #tpu.memory_space<vmem>>, vector<1x8x8xbf16>,
      %163 = vector.extract_strided_slice %152 {offsets = [0, 8], sizes = [8, 8], strides = [1, 1]} : vector<8x32xbf16> to vector<8x8xbf16>
      %c1_87 = arith.constant 1 : index
      %c0_88 = arith.constant 0 : index
      %c0_89 = arith.constant 0 : index
      %164 = vector.load %arg11[%c1_87, %c0_88, %c0_89] : memref<4x8x8xbf16, #tpu.memory_space<vmem>>, vector<1x8x8xbf16>
      %165 = vector.shape_cast %164 : vector<1x8x8xbf16> to vector<8x8xbf16>
      %166 = vector.shape_cast %163 : vector<8x8xbf16> to vector<1x8x8xbf16>
      tpu.vector_store %arg11[%c1_87, %c0_88, %c0_89], %166 {strides = array<i32>} : memref<4x8x8xbf16, #tpu.memory_space<vmem>>, vector<1x8x8xbf16>,
      %167 = vector.extract_strided_slice %154 {offsets = [0, 8], sizes = [8, 8], strides = [1, 1]} : vector<8x32xbf16> to vector<8x8xbf16>
      %c1_90 = arith.constant 1 : index
      %c0_91 = arith.constant 0 : index
      %c0_92 = arith.constant 0 : index
      %168 = vector.load %arg12[%c1_90, %c0_91, %c0_92] : memref<4x8x8xbf16, #tpu.memory_space<vmem>>, vector<1x8x8xbf16>
      %169 = vector.shape_cast %168 : vector<1x8x8xbf16> to vector<8x8xbf16>
      %170 = vector.shape_cast %167 : vector<8x8xbf16> to vector<1x8x8xbf16>
      tpu.vector_store %arg12[%c1_90, %c0_91, %c0_92], %170 {strides = array<i32>} : memref<4x8x8xbf16, #tpu.memory_space<vmem>>, vector<1x8x8xbf16>,
      %171 = vector.extract_strided_slice %152 {offsets = [0, 16], sizes = [8, 8], strides = [1, 1]} : vector<8x32xbf16> to vector<8x8xbf16>
      %c2_93 = arith.constant 2 : index
      %c0_94 = arith.constant 0 : index
      %c0_95 = arith.constant 0 : index
      %172 = vector.load %arg11[%c2_93, %c0_94, %c0_95] : memref<4x8x8xbf16, #tpu.memory_space<vmem>>, vector<1x8x8xbf16>
      %173 = vector.shape_cast %172 : vector<1x8x8xbf16> to vector<8x8xbf16>
      %174 = vector.shape_cast %171 : vector<8x8xbf16> to vector<1x8x8xbf16>
      tpu.vector_store %arg11[%c2_93, %c0_94, %c0_95], %174 {strides = array<i32>} : memref<4x8x8xbf16, #tpu.memory_space<vmem>>, vector<1x8x8xbf16>,
      %175 = vector.extract_strided_slice %154 {offsets = [0, 16], sizes = [8, 8], strides = [1, 1]} : vector<8x32xbf16> to vector<8x8xbf16>
      %c2_96 = arith.constant 2 : index
      %c0_97 = arith.constant 0 : index
      %c0_98 = arith.constant 0 : index
      %176 = vector.load %arg12[%c2_96, %c0_97, %c0_98] : memref<4x8x8xbf16, #tpu.memory_space<vmem>>, vector<1x8x8xbf16>
      %177 = vector.shape_cast %176 : vector<1x8x8xbf16> to vector<8x8xbf16>
      %178 = vector.shape_cast %175 : vector<8x8xbf16> to vector<1x8x8xbf16>
      tpu.vector_store %arg12[%c2_96, %c0_97, %c0_98], %178 {strides = array<i32>} : memref<4x8x8xbf16, #tpu.memory_space<vmem>>, vector<1x8x8xbf16>,
      %179 = vector.extract_strided_slice %152 {offsets = [0, 24], sizes = [8, 8], strides = [1, 1]} : vector<8x32xbf16> to vector<8x8xbf16>
      %c3_99 = arith.constant 3 : index
      %c0_100 = arith.constant 0 : index
      %c0_101 = arith.constant 0 : index
      %180 = vector.load %arg11[%c3_99, %c0_100, %c0_101] : memref<4x8x8xbf16, #tpu.memory_space<vmem>>, vector<1x8x8xbf16>
      %181 = vector.shape_cast %180 : vector<1x8x8xbf16> to vector<8x8xbf16>
      %182 = vector.shape_cast %179 : vector<8x8xbf16> to vector<1x8x8xbf16>
      tpu.vector_store %arg11[%c3_99, %c0_100, %c0_101], %182 {strides = array<i32>} : memref<4x8x8xbf16, #tpu.memory_space<vmem>>, vector<1x8x8xbf16>,
      %183 = vector.extract_strided_slice %154 {offsets = [0, 24], sizes = [8, 8], strides = [1, 1]} : vector<8x32xbf16> to vector<8x8xbf16>
      %c3_102 = arith.constant 3 : index
      %c0_103 = arith.constant 0 : index
      %c0_104 = arith.constant 0 : index
      %184 = vector.load %arg12[%c3_102, %c0_103, %c0_104] : memref<4x8x8xbf16, #tpu.memory_space<vmem>>, vector<1x8x8xbf16>
      %185 = vector.shape_cast %184 : vector<1x8x8xbf16> to vector<8x8xbf16>
      %186 = vector.shape_cast %183 : vector<8x8xbf16> to vector<1x8x8xbf16>
      tpu.vector_store %arg12[%c3_102, %c0_103, %c0_104], %186 {strides = array<i32>} : memref<4x8x8xbf16, #tpu.memory_space<vmem>>, vector<1x8x8xbf16>,
    } else {
    }
    %c8_i32 = arith.constant 8 : i32
    %5 = arith.muli %arg1, %c8_i32 : i32
    %6 = tpu.assume_multiple %5, 8 : i32
    %c0_4 = arith.constant 0 : index
    %7 = arith.index_cast %6 : i32 to index
    %c0_5 = arith.constant 0 : index
    %8 = vector.load %arg2[%c0_4, %7, %c0_5] : memref<1x8x32xf32, #tpu.memory_space<vmem>>, vector<1x8x32xf32>
    %9 = vector.shape_cast %8 : vector<1x8x32xf32> to vector<8x32xf32>
    %10 = arith.index_cast %6 : i32 to index
    %c0_6 = arith.constant 0 : index
    %11 = vector.load %arg10[%10, %c0_6] : memref<8x32xbf16, #tpu.memory_space<vmem>>, vector<8x32xbf16>
    %c0_7 = arith.constant 0 : index
    %c0_8 = arith.constant 0 : index
    %12 = vector.load %arg6[%c0_7, %c0_8] : memref<32x32xbf16, #tpu.memory_space<vmem>>, vector<32x32xbf16>
    %cst = arith.constant dense<0.000000e+00> : vector<8x32xf32>
    %13 = tpu.matmul %11, %12, %cst {dimension_numbers = #tpu.dot_dimension_numbers<[1], [0], [0], [1], [0, 0, 1, 1], [], []>} : vector<8x32xbf16>, vector<32x32xbf16>, vector<8x32xf32> -> vector<8x32xf32>
    %cst_9 = arith.constant 0.353553385 : f32
    %14 = vector.broadcast %cst_9 : f32 to vector<8x32xf32>
    %15 = arith.mulf %13, %14 : vector<8x32xf32>
    %16 = arith.truncf %15 : vector<8x32xf32> to vector<8x32xbf16>
    %c0_10 = arith.constant 0 : index
    %c0_11 = arith.constant 0 : index
    %c0_12 = arith.constant 0 : index
    %17 = vector.load %arg3[%c0_10, %c0_11, %c0_12] : memref<1x8x8xi8, #tpu.memory_space<vmem>>, vector<1x8x8xi8>
    %18 = vector.shape_cast %17 : vector<1x8x8xi8> to vector<8x8xi8>
    %19 = arith.extsi %18 : vector<8x8xi8> to vector<8x8xi32>
    %c0_i32_13 = arith.constant 0 : i32
    %20 = vector.broadcast %c0_i32_13 : i32 to vector<8x8xi32>
    %21 = arith.cmpi eq, %19, %20 : vector<8x8xi32>
    %cst_14 = arith.constant 0.000000e+00 : f32
    %22 = vector.broadcast %cst_14 : f32 to vector<8x32xf32>
    %23 = vector.extract_strided_slice %16 {offsets = [0, 0], sizes = [8, 8], strides = [1, 1]} : vector<8x32xbf16> to vector<8x8xbf16>
    %c0_15 = arith.constant 0 : index
    %c0_16 = arith.constant 0 : index
    %c0_17 = arith.constant 0 : index
    %24 = vector.load %arg11[%c0_15, %c0_16, %c0_17] : memref<4x8x8xbf16, #tpu.memory_space<vmem>>, vector<1x8x8xbf16>
    %25 = vector.shape_cast %24 : vector<1x8x8xbf16> to vector<8x8xbf16>
    %c0_18 = arith.constant 0 : index
    %c0_19 = arith.constant 0 : index
    %c0_20 = arith.constant 0 : index
    %26 = vector.load %arg12[%c0_18, %c0_19, %c0_20] : memref<4x8x8xbf16, #tpu.memory_space<vmem>>, vector<1x8x8xbf16>
    %27 = vector.shape_cast %26 : vector<1x8x8xbf16> to vector<8x8xbf16>
    %cst_21 = arith.constant dense<0.000000e+00> : vector<8x8xf32>
    %28 = tpu.matmul %23, %25, %cst_21 {dimension_numbers = #tpu.dot_dimension_numbers<[1], [1], [0], [0], [0, 0, 1, 0], [], []>} : vector<8x8xbf16>, vector<8x8xbf16>, vector<8x8xf32> -> vector<8x8xf32>
    %cst_22 = arith.constant -1.000000e+09 : f32
    %29 = vector.broadcast %cst_22 : f32 to vector<8x8xf32>
    %30 = arith.select %21, %29, %28 : vector<8x8xi1>, vector<8x8xf32>
    %cst_23 = arith.constant dense<0xFF800000> : vector<8xf32>
    %31 = vector.multi_reduction <maximumf>, %30, %cst_23 [1] : vector<8x8xf32> to vector<8xf32>
    %32 = vector.shape_cast %31 : vector<8xf32> to vector<8x1xf32>
    %33 = vector.broadcast %32 : vector<8x1xf32> to vector<8x8xf32>
    %34 = arith.subf %30, %33 : vector<8x8xf32>
    %35 = math.exp %34 : vector<8x8xf32>
    %cst_24 = arith.constant dense<0.000000e+00> : vector<8xf32>
    %36 = vector.multi_reduction <add>, %35, %cst_24 [1] : vector<8x8xf32> to vector<8xf32>
    %37 = vector.shape_cast %36 : vector<8xf32> to vector<8x1xf32>
    %38 = tpu.reciprocal %37 {approx = true} : vector<8x1xf32> -> vector<8x1xf32>
    %39 = vector.broadcast %38 : vector<8x1xf32> to vector<8x8xf32>
    %40 = arith.mulf %35, %39 : vector<8x8xf32>
    %41 = arith.truncf %40 : vector<8x8xf32> to vector<8x8xbf16>
    %cst_25 = arith.constant dense<0.000000e+00> : vector<8x8xf32>
    %42 = tpu.matmul %41, %27, %cst_25 {dimension_numbers = #tpu.dot_dimension_numbers<[1], [0], [0], [1], [0, 0, 1, 1], [], []>} : vector<8x8xbf16>, vector<8x8xbf16>, vector<8x8xf32> -> vector<8x8xf32>
    %43 = arith.truncf %42 : vector<8x8xf32> to vector<8x8xbf16>
    %c0_26 = arith.constant 0 : index
    %c0_27 = arith.constant 0 : index
    %44 = vector.load %arg8[%c0_26, %c0_27] : memref<32x32xbf16, #tpu.memory_space<vmem>>, vector<8x32xbf16>
    %cst_28 = arith.constant dense<0.000000e+00> : vector<8x32xf32>
    %45 = tpu.matmul %43, %44, %cst_28 {dimension_numbers = #tpu.dot_dimension_numbers<[1], [0], [0], [1], [0, 0, 1, 1], [], []>} : vector<8x8xbf16>, vector<8x32xbf16>, vector<8x32xf32> -> vector<8x32xf32>
    %46 = arith.addf %22, %45 : vector<8x32xf32>
    %47 = vector.extract_strided_slice %16 {offsets = [0, 8], sizes = [8, 8], strides = [1, 1]} : vector<8x32xbf16> to vector<8x8xbf16>
    %c1 = arith.constant 1 : index
    %c0_29 = arith.constant 0 : index
    %c0_30 = arith.constant 0 : index
    %48 = vector.load %arg11[%c1, %c0_29, %c0_30] : memref<4x8x8xbf16, #tpu.memory_space<vmem>>, vector<1x8x8xbf16>
    %49 = vector.shape_cast %48 : vector<1x8x8xbf16> to vector<8x8xbf16>
    %c1_31 = arith.constant 1 : index
    %c0_32 = arith.constant 0 : index
    %c0_33 = arith.constant 0 : index
    %50 = vector.load %arg12[%c1_31, %c0_32, %c0_33] : memref<4x8x8xbf16, #tpu.memory_space<vmem>>, vector<1x8x8xbf16>
    %51 = vector.shape_cast %50 : vector<1x8x8xbf16> to vector<8x8xbf16>
    %cst_34 = arith.constant dense<0.000000e+00> : vector<8x8xf32>
    %52 = tpu.matmul %47, %49, %cst_34 {dimension_numbers = #tpu.dot_dimension_numbers<[1], [1], [0], [0], [0, 0, 1, 0], [], []>} : vector<8x8xbf16>, vector<8x8xbf16>, vector<8x8xf32> -> vector<8x8xf32>
    %cst_35 = arith.constant -1.000000e+09 : f32
    %53 = vector.broadcast %cst_35 : f32 to vector<8x8xf32>
    %54 = arith.select %21, %53, %52 : vector<8x8xi1>, vector<8x8xf32>
    %cst_36 = arith.constant dense<0xFF800000> : vector<8xf32>
    %55 = vector.multi_reduction <maximumf>, %54, %cst_36 [1] : vector<8x8xf32> to vector<8xf32>
    %56 = vector.shape_cast %55 : vector<8xf32> to vector<8x1xf32>
    %57 = vector.broadcast %56 : vector<8x1xf32> to vector<8x8xf32>
    %58 = arith.subf %54, %57 : vector<8x8xf32>
    %59 = math.exp %58 : vector<8x8xf32>
    %cst_37 = arith.constant dense<0.000000e+00> : vector<8xf32>
    %60 = vector.multi_reduction <add>, %59, %cst_37 [1] : vector<8x8xf32> to vector<8xf32>
    %61 = vector.shape_cast %60 : vector<8xf32> to vector<8x1xf32>
    %62 = tpu.reciprocal %61 {approx = true} : vector<8x1xf32> -> vector<8x1xf32>
    %63 = vector.broadcast %62 : vector<8x1xf32> to vector<8x8xf32>
    %64 = arith.mulf %59, %63 : vector<8x8xf32>
    %65 = arith.truncf %64 : vector<8x8xf32> to vector<8x8xbf16>
    %cst_38 = arith.constant dense<0.000000e+00> : vector<8x8xf32>
    %66 = tpu.matmul %65, %51, %cst_38 {dimension_numbers = #tpu.dot_dimension_numbers<[1], [0], [0], [1], [0, 0, 1, 1], [], []>} : vector<8x8xbf16>, vector<8x8xbf16>, vector<8x8xf32> -> vector<8x8xf32>
    %67 = arith.truncf %66 : vector<8x8xf32> to vector<8x8xbf16>
    %c8 = arith.constant 8 : index
    %c0_39 = arith.constant 0 : index
    %68 = vector.load %arg8[%c8, %c0_39] : memref<32x32xbf16, #tpu.memory_space<vmem>>, vector<8x32xbf16>
    %cst_40 = arith.constant dense<0.000000e+00> : vector<8x32xf32>
    %69 = tpu.matmul %67, %68, %cst_40 {dimension_numbers = #tpu.dot_dimension_numbers<[1], [0], [0], [1], [0, 0, 1, 1], [], []>} : vector<8x8xbf16>, vector<8x32xbf16>, vector<8x32xf32> -> vector<8x32xf32>
    %70 = arith.addf %46, %69 : vector<8x32xf32>
    %71 = vector.extract_strided_slice %16 {offsets = [0, 16], sizes = [8, 8], strides = [1, 1]} : vector<8x32xbf16> to vector<8x8xbf16>
    %c2 = arith.constant 2 : index
    %c0_41 = arith.constant 0 : index
    %c0_42 = arith.constant 0 : index
    %72 = vector.load %arg11[%c2, %c0_41, %c0_42] : memref<4x8x8xbf16, #tpu.memory_space<vmem>>, vector<1x8x8xbf16>
    %73 = vector.shape_cast %72 : vector<1x8x8xbf16> to vector<8x8xbf16>
    %c2_43 = arith.constant 2 : index
    %c0_44 = arith.constant 0 : index
    %c0_45 = arith.constant 0 : index
    %74 = vector.load %arg12[%c2_43, %c0_44, %c0_45] : memref<4x8x8xbf16, #tpu.memory_space<vmem>>, vector<1x8x8xbf16>
    %75 = vector.shape_cast %74 : vector<1x8x8xbf16> to vector<8x8xbf16>
    %cst_46 = arith.constant dense<0.000000e+00> : vector<8x8xf32>
    %76 = tpu.matmul %71, %73, %cst_46 {dimension_numbers = #tpu.dot_dimension_numbers<[1], [1], [0], [0], [0, 0, 1, 0], [], []>} : vector<8x8xbf16>, vector<8x8xbf16>, vector<8x8xf32> -> vector<8x8xf32>
    %cst_47 = arith.constant -1.000000e+09 : f32
    %77 = vector.broadcast %cst_47 : f32 to vector<8x8xf32>
    %78 = arith.select %21, %77, %76 : vector<8x8xi1>, vector<8x8xf32>
    %cst_48 = arith.constant dense<0xFF800000> : vector<8xf32>
    %79 = vector.multi_reduction <maximumf>, %78, %cst_48 [1] : vector<8x8xf32> to vector<8xf32>
    %80 = vector.shape_cast %79 : vector<8xf32> to vector<8x1xf32>
    %81 = vector.broadcast %80 : vector<8x1xf32> to vector<8x8xf32>
    %82 = arith.subf %78, %81 : vector<8x8xf32>
    %83 = math.exp %82 : vector<8x8xf32>
    %cst_49 = arith.constant dense<0.000000e+00> : vector<8xf32>
    %84 = vector.multi_reduction <add>, %83, %cst_49 [1] : vector<8x8xf32> to vector<8xf32>
    %85 = vector.shape_cast %84 : vector<8xf32> to vector<8x1xf32>
    %86 = tpu.reciprocal %85 {approx = true} : vector<8x1xf32> -> vector<8x1xf32>
    %87 = vector.broadcast %86 : vector<8x1xf32> to vector<8x8xf32>
    %88 = arith.mulf %83, %87 : vector<8x8xf32>
    %89 = arith.truncf %88 : vector<8x8xf32> to vector<8x8xbf16>
    %cst_50 = arith.constant dense<0.000000e+00> : vector<8x8xf32>
    %90 = tpu.matmul %89, %75, %cst_50 {dimension_numbers = #tpu.dot_dimension_numbers<[1], [0], [0], [1], [0, 0, 1, 1], [], []>} : vector<8x8xbf16>, vector<8x8xbf16>, vector<8x8xf32> -> vector<8x8xf32>
    %91 = arith.truncf %90 : vector<8x8xf32> to vector<8x8xbf16>
    %c16 = arith.constant 16 : index
    %c0_51 = arith.constant 0 : index
    %92 = vector.load %arg8[%c16, %c0_51] : memref<32x32xbf16, #tpu.memory_space<vmem>>, vector<8x32xbf16>
    %cst_52 = arith.constant dense<0.000000e+00> : vector<8x32xf32>
    %93 = tpu.matmul %91, %92, %cst_52 {dimension_numbers = #tpu.dot_dimension_numbers<[1], [0], [0], [1], [0, 0, 1, 1], [], []>} : vector<8x8xbf16>, vector<8x32xbf16>, vector<8x32xf32> -> vector<8x32xf32>
    %94 = arith.addf %70, %93 : vector<8x32xf32>
    %95 = vector.extract_strided_slice %16 {offsets = [0, 24], sizes = [8, 8], strides = [1, 1]} : vector<8x32xbf16> to vector<8x8xbf16>
    %c3 = arith.constant 3 : index
    %c0_53 = arith.constant 0 : index
    %c0_54 = arith.constant 0 : index
    %96 = vector.load %arg11[%c3, %c0_53, %c0_54] : memref<4x8x8xbf16, #tpu.memory_space<vmem>>, vector<1x8x8xbf16>
    %97 = vector.shape_cast %96 : vector<1x8x8xbf16> to vector<8x8xbf16>
    %c3_55 = arith.constant 3 : index
    %c0_56 = arith.constant 0 : index
    %c0_57 = arith.constant 0 : index
    %98 = vector.load %arg12[%c3_55, %c0_56, %c0_57] : memref<4x8x8xbf16, #tpu.memory_space<vmem>>, vector<1x8x8xbf16>
    %99 = vector.shape_cast %98 : vector<1x8x8xbf16> to vector<8x8xbf16>
    %cst_58 = arith.constant dense<0.000000e+00> : vector<8x8xf32>
    %100 = tpu.matmul %95, %97, %cst_58 {dimension_numbers = #tpu.dot_dimension_numbers<[1], [1], [0], [0], [0, 0, 1, 0], [], []>} : vector<8x8xbf16>, vector<8x8xbf16>, vector<8x8xf32> -> vector<8x8xf32>
    %cst_59 = arith.constant -1.000000e+09 : f32
    %101 = vector.broadcast %cst_59 : f32 to vector<8x8xf32>
    %102 = arith.select %21, %101, %100 : vector<8x8xi1>, vector<8x8xf32>
    %cst_60 = arith.constant dense<0xFF800000> : vector<8xf32>
    %103 = vector.multi_reduction <maximumf>, %102, %cst_60 [1] : vector<8x8xf32> to vector<8xf32>
    %104 = vector.shape_cast %103 : vector<8xf32> to vector<8x1xf32>
    %105 = vector.broadcast %104 : vector<8x1xf32> to vector<8x8xf32>
    %106 = arith.subf %102, %105 : vector<8x8xf32>
    %107 = math.exp %106 : vector<8x8xf32>
    %cst_61 = arith.constant dense<0.000000e+00> : vector<8xf32>
    %108 = vector.multi_reduction <add>, %107, %cst_61 [1] : vector<8x8xf32> to vector<8xf32>
    %109 = vector.shape_cast %108 : vector<8xf32> to vector<8x1xf32>
    %110 = tpu.reciprocal %109 {approx = true} : vector<8x1xf32> -> vector<8x1xf32>
    %111 = vector.broadcast %110 : vector<8x1xf32> to vector<8x8xf32>
    %112 = arith.mulf %107, %111 : vector<8x8xf32>
    %113 = arith.truncf %112 : vector<8x8xf32> to vector<8x8xbf16>
    %cst_62 = arith.constant dense<0.000000e+00> : vector<8x8xf32>
    %114 = tpu.matmul %113, %99, %cst_62 {dimension_numbers = #tpu.dot_dimension_numbers<[1], [0], [0], [1], [0, 0, 1, 1], [], []>} : vector<8x8xbf16>, vector<8x8xbf16>, vector<8x8xf32> -> vector<8x8xf32>
    %115 = arith.truncf %114 : vector<8x8xf32> to vector<8x8xbf16>
    %c24 = arith.constant 24 : index
    %c0_63 = arith.constant 0 : index
    %116 = vector.load %arg8[%c24, %c0_63] : memref<32x32xbf16, #tpu.memory_space<vmem>>, vector<8x32xbf16>
    %cst_64 = arith.constant dense<0.000000e+00> : vector<8x32xf32>
    %117 = tpu.matmul %115, %116, %cst_64 {dimension_numbers = #tpu.dot_dimension_numbers<[1], [0], [0], [1], [0, 0, 1, 1], [], []>} : vector<8x8xbf16>, vector<8x32xbf16>, vector<8x32xf32> -> vector<8x32xf32>
    %118 = arith.addf %94, %117 : vector<8x32xf32>
    %119 = arith.addf %9, %118 : vector<8x32xf32>
    %c0_65 = arith.constant 0 : index
    %c0_66 = arith.constant 0 : index
    %c0_67 = arith.constant 0 : index
    %120 = vector.load %arg9[%c0_65, %c0_66, %c0_67] : memref<1x8x32xf32, #tpu.memory_space<vmem>>, vector<1x8x32xf32>
    %121 = vector.shape_cast %120 : vector<1x8x32xf32> to vector<8x32xf32>
    %122 = vector.shape_cast %119 : vector<8x32xf32> to vector<1x8x32xf32>
    tpu.vector_store %arg9[%c0_65, %c0_66, %c0_67], %122 {strides = array<i32>} : memref<1x8x32xf32, #tpu.memory_space<vmem>>, vector<1x8x32xf32>,
    return
  }
  func.func @transform_0(%arg0: i32, %arg1: i32) -> (i32, i32, i32) {
    %c0_i32 = arith.constant 0 : i32
    %c0_i32_0 = arith.constant 0 : i32
    %c0_i32_1 = arith.constant 0 : i32
    return %arg0, %c0_i32, %c0_i32_0 : i32, i32, i32
  }
  func.func @transform_1(%arg0: i32, %arg1: i32) -> (i32, i32, i32) {
    %c0_i32 = arith.constant 0 : i32
    %c0_i32_0 = arith.constant 0 : i32
    return %arg0, %arg1, %c0_i32 : i32, i32, i32
  }
  func.func @transform_2(%arg0: i32, %arg1: i32) -> (i32, i32) {
    %c0_i32 = arith.constant 0 : i32
    %c0_i32_0 = arith.constant 0 : i32
    %c0_i32_1 = arith.constant 0 : i32
    return %c0_i32, %c0_i32_0 : i32, i32
  }
  func.func @transform_3(%arg0: i32, %arg1: i32) -> (i32, i32) {
    %c0_i32 = arith.constant 0 : i32
    %c0_i32_0 = arith.constant 0 : i32
    %c0_i32_1 = arith.constant 0 : i32
    return %c0_i32, %c0_i32_0 : i32, i32
  }
  func.func @transform_4(%arg0: i32, %arg1: i32) -> (i32, i32) {
    %c0_i32 = arith.constant 0 : i32
    %c0_i32_0 = arith.constant 0 : i32
    %c0_i32_1 = arith.constant 0 : i32
    return %c0_i32, %c0_i32_0 : i32, i32
  }
  func.func @transform_5(%arg0: i32, %arg1: i32) -> (i32, i32) {
    %c0_i32 = arith.constant 0 : i32
    %c0_i32_0 = arith.constant 0 : i32
    %c0_i32_1 = arith.constant 0 : i32
    return %c0_i32, %c0_i32_0 : i32, i32
  }
  func.func @transform_6(%arg0: i32, %arg1: i32) -> (i32, i32) {
    %c0_i32 = arith.constant 0 : i32
    %c0_i32_0 = arith.constant 0 : i32
    %c0_i32_1 = arith.constant 0 : i32
    return %c0_i32, %c0_i32_0 : i32, i32
  }
  func.func @transform_7(%arg0: i32, %arg1: i32) -> (i32, i32, i32) {
    %c0_i32 = arith.constant 0 : i32
    %c0_i32_0 = arith.constant 0 : i32
    return %arg0, %arg1, %c0_i32 : i32, i32, i32
  }
}

module attributes {stable_mosaic.version = 11 : i64} {
  func.func @cross_attn_block_kernel(%arg0: i32, %arg1: i32, %arg2: memref<1x8x32xf32, #tpu.memory_space<vmem>>, %arg3: memref<1x8x32xf32, #tpu.memory_space<vmem>>, %arg4: memref<1x8x8xi8, #tpu.memory_space<vmem>>, %arg5: memref<1x32xf32, #tpu.memory_space<vmem>>, %arg6: memref<1x32xf32, #tpu.memory_space<vmem>>, %arg7: memref<32x32xbf16, #tpu.memory_space<vmem>>, %arg8: memref<32x64xbf16, #tpu.memory_space<vmem>>, %arg9: memref<32x32xbf16, #tpu.memory_space<vmem>>, %arg10: memref<1x8x32xf32, #tpu.memory_space<vmem>>, %arg11: memref<4x8x8xbf16, #tpu.memory_space<vmem>>, %arg12: memref<4x8x8xbf16, #tpu.memory_space<vmem>>) attributes {dimension_semantics = [#tpu.dimension_semantics<parallel>, #tpu.dimension_semantics<arbitrary>], iteration_bounds = array<i64: 2, 1>, scalar_prefetch = 0 : i64, scratch_operands = 2 : i64, tpu.core_type = #tpu.core_type<tc>, window_params = [{transform_indices = @transform_0, window_bounds = array<i64: 1, 8, 32>}, {transform_indices = @transform_1, window_bounds = array<i64: 1, 8, 32>}, {transform_indices = @transform_2, window_bounds = array<i64: 1, 8, 8>}, {pipeline_mode = #tpu.pipeline_mode<synchronous>, transform_indices = @transform_3, window_bounds = array<i64: 1, 32>}, {pipeline_mode = #tpu.pipeline_mode<synchronous>, transform_indices = @transform_4, window_bounds = array<i64: 1, 32>}, {pipeline_mode = #tpu.pipeline_mode<synchronous>, transform_indices = @transform_5, window_bounds = array<i64: 32, 32>}, {pipeline_mode = #tpu.pipeline_mode<synchronous>, transform_indices = @transform_6, window_bounds = array<i64: 32, 64>}, {pipeline_mode = #tpu.pipeline_mode<synchronous>, transform_indices = @transform_7, window_bounds = array<i64: 32, 32>}, {transform_indices = @transform_8, window_bounds = array<i64: 1, 8, 32>}]} {
    %c0_i32 = arith.constant 0 : i32
    %0 = arith.cmpi eq, %arg1, %c0_i32 : i32
    %1 = arith.extui %0 : i1 to i32
    %c0_i32_0 = arith.constant 0 : i32
    %2 = arith.cmpi ne, %1, %c0_i32_0 : i32
    scf.if %2 {
      %c0_73 = arith.constant 0 : index
      %c0_74 = arith.constant 0 : index
      %c0_75 = arith.constant 0 : index
      %141 = vector.load %arg3[%c0_73, %c0_74, %c0_75] : memref<1x8x32xf32, #tpu.memory_space<vmem>>, vector<1x8x32xf32>
      %142 = vector.shape_cast %141 : vector<1x8x32xf32> to vector<8x32xf32>
      %143 = arith.truncf %142 : vector<8x32xf32> to vector<8x32xbf16>
      %c0_76 = arith.constant 0 : index
      %c0_77 = arith.constant 0 : index
      %144 = vector.load %arg8[%c0_76, %c0_77] : memref<32x64xbf16, #tpu.memory_space<vmem>>, vector<32x64xbf16>
      %cst_78 = arith.constant dense<0.000000e+00> : vector<8x64xf32>
      %145 = tpu.matmul %143, %144, %cst_78 {dimension_numbers = #tpu.dot_dimension_numbers<[1], [0], [0], [1], [0, 0, 1, 1], [], []>} : vector<8x32xbf16>, vector<32x64xbf16>, vector<8x64xf32> -> vector<8x64xf32>
      %146 = vector.extract_strided_slice %145 {offsets = [0, 0], sizes = [8, 32], strides = [1, 1]} : vector<8x64xf32> to vector<8x32xf32>
      %147 = arith.truncf %146 : vector<8x32xf32> to vector<8x32xbf16>
      %148 = vector.extract_strided_slice %145 {offsets = [0, 32], sizes = [8, 32], strides = [1, 1]} : vector<8x64xf32> to vector<8x32xf32>
      %149 = arith.truncf %148 : vector<8x32xf32> to vector<8x32xbf16>
      %150 = vector.extract_strided_slice %147 {offsets = [0, 0], sizes = [8, 8], strides = [1, 1]} : vector<8x32xbf16> to vector<8x8xbf16>
      %c0_79 = arith.constant 0 : index
      %c0_80 = arith.constant 0 : index
      %c0_81 = arith.constant 0 : index
      %151 = vector.load %arg11[%c0_79, %c0_80, %c0_81] : memref<4x8x8xbf16, #tpu.memory_space<vmem>>, vector<1x8x8xbf16>
      %152 = vector.shape_cast %151 : vector<1x8x8xbf16> to vector<8x8xbf16>
      %153 = vector.shape_cast %150 : vector<8x8xbf16> to vector<1x8x8xbf16>
      tpu.vector_store %arg11[%c0_79, %c0_80, %c0_81], %153 {strides = array<i32>} : memref<4x8x8xbf16, #tpu.memory_space<vmem>>, vector<1x8x8xbf16>,
      %154 = vector.extract_strided_slice %149 {offsets = [0, 0], sizes = [8, 8], strides = [1, 1]} : vector<8x32xbf16> to vector<8x8xbf16>
      %c0_82 = arith.constant 0 : index
      %c0_83 = arith.constant 0 : index
      %c0_84 = arith.constant 0 : index
      %155 = vector.load %arg12[%c0_82, %c0_83, %c0_84] : memref<4x8x8xbf16, #tpu.memory_space<vmem>>, vector<1x8x8xbf16>
      %156 = vector.shape_cast %155 : vector<1x8x8xbf16> to vector<8x8xbf16>
      %157 = vector.shape_cast %154 : vector<8x8xbf16> to vector<1x8x8xbf16>
      tpu.vector_store %arg12[%c0_82, %c0_83, %c0_84], %157 {strides = array<i32>} : memref<4x8x8xbf16, #tpu.memory_space<vmem>>, vector<1x8x8xbf16>,
      %158 = vector.extract_strided_slice %147 {offsets = [0, 8], sizes = [8, 8], strides = [1, 1]} : vector<8x32xbf16> to vector<8x8xbf16>
      %c1_85 = arith.constant 1 : index
      %c0_86 = arith.constant 0 : index
      %c0_87 = arith.constant 0 : index
      %159 = vector.load %arg11[%c1_85, %c0_86, %c0_87] : memref<4x8x8xbf16, #tpu.memory_space<vmem>>, vector<1x8x8xbf16>
      %160 = vector.shape_cast %159 : vector<1x8x8xbf16> to vector<8x8xbf16>
      %161 = vector.shape_cast %158 : vector<8x8xbf16> to vector<1x8x8xbf16>
      tpu.vector_store %arg11[%c1_85, %c0_86, %c0_87], %161 {strides = array<i32>} : memref<4x8x8xbf16, #tpu.memory_space<vmem>>, vector<1x8x8xbf16>,
      %162 = vector.extract_strided_slice %149 {offsets = [0, 8], sizes = [8, 8], strides = [1, 1]} : vector<8x32xbf16> to vector<8x8xbf16>
      %c1_88 = arith.constant 1 : index
      %c0_89 = arith.constant 0 : index
      %c0_90 = arith.constant 0 : index
      %163 = vector.load %arg12[%c1_88, %c0_89, %c0_90] : memref<4x8x8xbf16, #tpu.memory_space<vmem>>, vector<1x8x8xbf16>
      %164 = vector.shape_cast %163 : vector<1x8x8xbf16> to vector<8x8xbf16>
      %165 = vector.shape_cast %162 : vector<8x8xbf16> to vector<1x8x8xbf16>
      tpu.vector_store %arg12[%c1_88, %c0_89, %c0_90], %165 {strides = array<i32>} : memref<4x8x8xbf16, #tpu.memory_space<vmem>>, vector<1x8x8xbf16>,
      %166 = vector.extract_strided_slice %147 {offsets = [0, 16], sizes = [8, 8], strides = [1, 1]} : vector<8x32xbf16> to vector<8x8xbf16>
      %c2_91 = arith.constant 2 : index
      %c0_92 = arith.constant 0 : index
      %c0_93 = arith.constant 0 : index
      %167 = vector.load %arg11[%c2_91, %c0_92, %c0_93] : memref<4x8x8xbf16, #tpu.memory_space<vmem>>, vector<1x8x8xbf16>
      %168 = vector.shape_cast %167 : vector<1x8x8xbf16> to vector<8x8xbf16>
      %169 = vector.shape_cast %166 : vector<8x8xbf16> to vector<1x8x8xbf16>
      tpu.vector_store %arg11[%c2_91, %c0_92, %c0_93], %169 {strides = array<i32>} : memref<4x8x8xbf16, #tpu.memory_space<vmem>>, vector<1x8x8xbf16>,
      %170 = vector.extract_strided_slice %149 {offsets = [0, 16], sizes = [8, 8], strides = [1, 1]} : vector<8x32xbf16> to vector<8x8xbf16>
      %c2_94 = arith.constant 2 : index
      %c0_95 = arith.constant 0 : index
      %c0_96 = arith.constant 0 : index
      %171 = vector.load %arg12[%c2_94, %c0_95, %c0_96] : memref<4x8x8xbf16, #tpu.memory_space<vmem>>, vector<1x8x8xbf16>
      %172 = vector.shape_cast %171 : vector<1x8x8xbf16> to vector<8x8xbf16>
      %173 = vector.shape_cast %170 : vector<8x8xbf16> to vector<1x8x8xbf16>
      tpu.vector_store %arg12[%c2_94, %c0_95, %c0_96], %173 {strides = array<i32>} : memref<4x8x8xbf16, #tpu.memory_space<vmem>>, vector<1x8x8xbf16>,
      %174 = vector.extract_strided_slice %147 {offsets = [0, 24], sizes = [8, 8], strides = [1, 1]} : vector<8x32xbf16> to vector<8x8xbf16>
      %c3_97 = arith.constant 3 : index
      %c0_98 = arith.constant 0 : index
      %c0_99 = arith.constant 0 : index
      %175 = vector.load %arg11[%c3_97, %c0_98, %c0_99] : memref<4x8x8xbf16, #tpu.memory_space<vmem>>, vector<1x8x8xbf16>
      %176 = vector.shape_cast %175 : vector<1x8x8xbf16> to vector<8x8xbf16>
      %177 = vector.shape_cast %174 : vector<8x8xbf16> to vector<1x8x8xbf16>
      tpu.vector_store %arg11[%c3_97, %c0_98, %c0_99], %177 {strides = array<i32>} : memref<4x8x8xbf16, #tpu.memory_space<vmem>>, vector<1x8x8xbf16>,
      %178 = vector.extract_strided_slice %149 {offsets = [0, 24], sizes = [8, 8], strides = [1, 1]} : vector<8x32xbf16> to vector<8x8xbf16>
      %c3_100 = arith.constant 3 : index
      %c0_101 = arith.constant 0 : index
      %c0_102 = arith.constant 0 : index
      %179 = vector.load %arg12[%c3_100, %c0_101, %c0_102] : memref<4x8x8xbf16, #tpu.memory_space<vmem>>, vector<1x8x8xbf16>
      %180 = vector.shape_cast %179 : vector<1x8x8xbf16> to vector<8x8xbf16>
      %181 = vector.shape_cast %178 : vector<8x8xbf16> to vector<1x8x8xbf16>
      tpu.vector_store %arg12[%c3_100, %c0_101, %c0_102], %181 {strides = array<i32>} : memref<4x8x8xbf16, #tpu.memory_space<vmem>>, vector<1x8x8xbf16>,
    } else {
    }
    %c0 = arith.constant 0 : index
    %c0_1 = arith.constant 0 : index
    %c0_2 = arith.constant 0 : index
    %3 = vector.load %arg2[%c0, %c0_1, %c0_2] : memref<1x8x32xf32, #tpu.memory_space<vmem>>, vector<1x8x32xf32>
    %4 = vector.shape_cast %3 : vector<1x8x32xf32> to vector<8x32xf32>
    %c0_3 = arith.constant 0 : index
    %c0_4 = arith.constant 0 : index
    %5 = vector.load %arg5[%c0_3, %c0_4] : memref<1x32xf32, #tpu.memory_space<vmem>>, vector<1x32xf32>
    %c0_5 = arith.constant 0 : index
    %c0_6 = arith.constant 0 : index
    %6 = vector.load %arg6[%c0_5, %c0_6] : memref<1x32xf32, #tpu.memory_space<vmem>>, vector<1x32xf32>
    %cst = arith.constant dense<0.000000e+00> : vector<8xf32>
    %7 = vector.multi_reduction <add>, %4, %cst [1] : vector<8x32xf32> to vector<8xf32>
    %8 = vector.shape_cast %7 : vector<8xf32> to vector<8x1xf32>
    %cst_7 = arith.constant 3.200000e+01 : f32
    %9 = vector.broadcast %cst_7 : f32 to vector<8x1xf32>
    %10 = arith.divf %8, %9 : vector<8x1xf32>
    %11 = vector.broadcast %10 : vector<8x1xf32> to vector<8x32xf32>
    %12 = arith.subf %4, %11 : vector<8x32xf32>
    %13 = arith.mulf %12, %12 : vector<8x32xf32>
    %cst_8 = arith.constant dense<0.000000e+00> : vector<8xf32>
    %14 = vector.multi_reduction <add>, %13, %cst_8 [1] : vector<8x32xf32> to vector<8xf32>
    %15 = vector.shape_cast %14 : vector<8xf32> to vector<8x1xf32>
    %cst_9 = arith.constant 3.100000e+01 : f32
    %16 = vector.broadcast %cst_9 : f32 to vector<8x1xf32>
    %17 = arith.divf %15, %16 : vector<8x1xf32>
    %18 = vector.broadcast %10 : vector<8x1xf32> to vector<8x32xf32>
    %19 = arith.subf %4, %18 : vector<8x32xf32>
    %20 = vector.broadcast %5 : vector<1x32xf32> to vector<8x32xf32>
    %21 = arith.mulf %20, %19 : vector<8x32xf32>
    %22 = math.sqrt %17 : vector<8x1xf32>
    %cst_10 = arith.constant 9.99999997E-7 : f32
    %23 = vector.broadcast %cst_10 : f32 to vector<8x1xf32>
    %24 = arith.addf %22, %23 : vector<8x1xf32>
    %25 = vector.broadcast %24 : vector<8x1xf32> to vector<8x32xf32>
    %26 = arith.divf %21, %25 : vector<8x32xf32>
    %27 = vector.broadcast %6 : vector<1x32xf32> to vector<8x32xf32>
    %28 = arith.addf %26, %27 : vector<8x32xf32>
    %29 = arith.truncf %28 : vector<8x32xf32> to vector<8x32xbf16>
    %c0_11 = arith.constant 0 : index
    %c0_12 = arith.constant 0 : index
    %30 = vector.load %arg7[%c0_11, %c0_12] : memref<32x32xbf16, #tpu.memory_space<vmem>>, vector<32x32xbf16>
    %cst_13 = arith.constant dense<0.000000e+00> : vector<8x32xf32>
    %31 = tpu.matmul %29, %30, %cst_13 {dimension_numbers = #tpu.dot_dimension_numbers<[1], [0], [0], [1], [0, 0, 1, 1], [], []>} : vector<8x32xbf16>, vector<32x32xbf16>, vector<8x32xf32> -> vector<8x32xf32>
    %cst_14 = arith.constant 0.353553385 : f32
    %32 = vector.broadcast %cst_14 : f32 to vector<8x32xf32>
    %33 = arith.mulf %31, %32 : vector<8x32xf32>
    %34 = arith.truncf %33 : vector<8x32xf32> to vector<8x32xbf16>
    %c0_15 = arith.constant 0 : index
    %c0_16 = arith.constant 0 : index
    %c0_17 = arith.constant 0 : index
    %35 = vector.load %arg4[%c0_15, %c0_16, %c0_17] : memref<1x8x8xi8, #tpu.memory_space<vmem>>, vector<1x8x8xi8>
    %36 = vector.shape_cast %35 : vector<1x8x8xi8> to vector<8x8xi8>
    %37 = arith.extsi %36 : vector<8x8xi8> to vector<8x8xi32>
    %c0_i32_18 = arith.constant 0 : i32
    %38 = vector.broadcast %c0_i32_18 : i32 to vector<8x8xi32>
    %39 = arith.cmpi eq, %37, %38 : vector<8x8xi32>
    %cst_19 = arith.constant 0.000000e+00 : f32
    %40 = vector.broadcast %cst_19 : f32 to vector<8x32xf32>
    %41 = vector.extract_strided_slice %34 {offsets = [0, 0], sizes = [8, 8], strides = [1, 1]} : vector<8x32xbf16> to vector<8x8xbf16>
    %c0_20 = arith.constant 0 : index
    %c0_21 = arith.constant 0 : index
    %c0_22 = arith.constant 0 : index
    %42 = vector.load %arg11[%c0_20, %c0_21, %c0_22] : memref<4x8x8xbf16, #tpu.memory_space<vmem>>, vector<1x8x8xbf16>
    %43 = vector.shape_cast %42 : vector<1x8x8xbf16> to vector<8x8xbf16>
    %c0_23 = arith.constant 0 : index
    %c0_24 = arith.constant 0 : index
    %c0_25 = arith.constant 0 : index
    %44 = vector.load %arg12[%c0_23, %c0_24, %c0_25] : memref<4x8x8xbf16, #tpu.memory_space<vmem>>, vector<1x8x8xbf16>
    %45 = vector.shape_cast %44 : vector<1x8x8xbf16> to vector<8x8xbf16>
    %cst_26 = arith.constant dense<0.000000e+00> : vector<8x8xf32>
    %46 = tpu.matmul %41, %43, %cst_26 {dimension_numbers = #tpu.dot_dimension_numbers<[1], [1], [0], [0], [0, 0, 1, 0], [], []>} : vector<8x8xbf16>, vector<8x8xbf16>, vector<8x8xf32> -> vector<8x8xf32>
    %cst_27 = arith.constant -1.000000e+09 : f32
    %47 = vector.broadcast %cst_27 : f32 to vector<8x8xf32>
    %48 = arith.select %39, %47, %46 : vector<8x8xi1>, vector<8x8xf32>
    %cst_28 = arith.constant dense<0xFF800000> : vector<8xf32>
    %49 = vector.multi_reduction <maximumf>, %48, %cst_28 [1] : vector<8x8xf32> to vector<8xf32>
    %50 = vector.shape_cast %49 : vector<8xf32> to vector<8x1xf32>
    %51 = vector.broadcast %50 : vector<8x1xf32> to vector<8x8xf32>
    %52 = arith.subf %48, %51 : vector<8x8xf32>
    %53 = math.exp %52 : vector<8x8xf32>
    %cst_29 = arith.constant dense<0.000000e+00> : vector<8xf32>
    %54 = vector.multi_reduction <add>, %53, %cst_29 [1] : vector<8x8xf32> to vector<8xf32>
    %55 = vector.shape_cast %54 : vector<8xf32> to vector<8x1xf32>
    %56 = tpu.reciprocal %55 {approx = true} : vector<8x1xf32> -> vector<8x1xf32>
    %57 = vector.broadcast %56 : vector<8x1xf32> to vector<8x8xf32>
    %58 = arith.mulf %53, %57 : vector<8x8xf32>
    %59 = arith.truncf %58 : vector<8x8xf32> to vector<8x8xbf16>
    %cst_30 = arith.constant dense<0.000000e+00> : vector<8x8xf32>
    %60 = tpu.matmul %59, %45, %cst_30 {dimension_numbers = #tpu.dot_dimension_numbers<[1], [0], [0], [1], [0, 0, 1, 1], [], []>} : vector<8x8xbf16>, vector<8x8xbf16>, vector<8x8xf32> -> vector<8x8xf32>
    %61 = arith.truncf %60 : vector<8x8xf32> to vector<8x8xbf16>
    %c0_31 = arith.constant 0 : index
    %c0_32 = arith.constant 0 : index
    %62 = vector.load %arg9[%c0_31, %c0_32] : memref<32x32xbf16, #tpu.memory_space<vmem>>, vector<8x32xbf16>
    %cst_33 = arith.constant dense<0.000000e+00> : vector<8x32xf32>
    %63 = tpu.matmul %61, %62, %cst_33 {dimension_numbers = #tpu.dot_dimension_numbers<[1], [0], [0], [1], [0, 0, 1, 1], [], []>} : vector<8x8xbf16>, vector<8x32xbf16>, vector<8x32xf32> -> vector<8x32xf32>
    %64 = arith.addf %40, %63 : vector<8x32xf32>
    %65 = vector.extract_strided_slice %34 {offsets = [0, 8], sizes = [8, 8], strides = [1, 1]} : vector<8x32xbf16> to vector<8x8xbf16>
    %c1 = arith.constant 1 : index
    %c0_34 = arith.constant 0 : index
    %c0_35 = arith.constant 0 : index
    %66 = vector.load %arg11[%c1, %c0_34, %c0_35] : memref<4x8x8xbf16, #tpu.memory_space<vmem>>, vector<1x8x8xbf16>
    %67 = vector.shape_cast %66 : vector<1x8x8xbf16> to vector<8x8xbf16>
    %c1_36 = arith.constant 1 : index
    %c0_37 = arith.constant 0 : index
    %c0_38 = arith.constant 0 : index
    %68 = vector.load %arg12[%c1_36, %c0_37, %c0_38] : memref<4x8x8xbf16, #tpu.memory_space<vmem>>, vector<1x8x8xbf16>
    %69 = vector.shape_cast %68 : vector<1x8x8xbf16> to vector<8x8xbf16>
    %cst_39 = arith.constant dense<0.000000e+00> : vector<8x8xf32>
    %70 = tpu.matmul %65, %67, %cst_39 {dimension_numbers = #tpu.dot_dimension_numbers<[1], [1], [0], [0], [0, 0, 1, 0], [], []>} : vector<8x8xbf16>, vector<8x8xbf16>, vector<8x8xf32> -> vector<8x8xf32>
    %cst_40 = arith.constant -1.000000e+09 : f32
    %71 = vector.broadcast %cst_40 : f32 to vector<8x8xf32>
    %72 = arith.select %39, %71, %70 : vector<8x8xi1>, vector<8x8xf32>
    %cst_41 = arith.constant dense<0xFF800000> : vector<8xf32>
    %73 = vector.multi_reduction <maximumf>, %72, %cst_41 [1] : vector<8x8xf32> to vector<8xf32>
    %74 = vector.shape_cast %73 : vector<8xf32> to vector<8x1xf32>
    %75 = vector.broadcast %74 : vector<8x1xf32> to vector<8x8xf32>
    %76 = arith.subf %72, %75 : vector<8x8xf32>
    %77 = math.exp %76 : vector<8x8xf32>
    %cst_42 = arith.constant dense<0.000000e+00> : vector<8xf32>
    %78 = vector.multi_reduction <add>, %77, %cst_42 [1] : vector<8x8xf32> to vector<8xf32>
    %79 = vector.shape_cast %78 : vector<8xf32> to vector<8x1xf32>
    %80 = tpu.reciprocal %79 {approx = true} : vector<8x1xf32> -> vector<8x1xf32>
    %81 = vector.broadcast %80 : vector<8x1xf32> to vector<8x8xf32>
    %82 = arith.mulf %77, %81 : vector<8x8xf32>
    %83 = arith.truncf %82 : vector<8x8xf32> to vector<8x8xbf16>
    %cst_43 = arith.constant dense<0.000000e+00> : vector<8x8xf32>
    %84 = tpu.matmul %83, %69, %cst_43 {dimension_numbers = #tpu.dot_dimension_numbers<[1], [0], [0], [1], [0, 0, 1, 1], [], []>} : vector<8x8xbf16>, vector<8x8xbf16>, vector<8x8xf32> -> vector<8x8xf32>
    %85 = arith.truncf %84 : vector<8x8xf32> to vector<8x8xbf16>
    %c8 = arith.constant 8 : index
    %c0_44 = arith.constant 0 : index
    %86 = vector.load %arg9[%c8, %c0_44] : memref<32x32xbf16, #tpu.memory_space<vmem>>, vector<8x32xbf16>
    %cst_45 = arith.constant dense<0.000000e+00> : vector<8x32xf32>
    %87 = tpu.matmul %85, %86, %cst_45 {dimension_numbers = #tpu.dot_dimension_numbers<[1], [0], [0], [1], [0, 0, 1, 1], [], []>} : vector<8x8xbf16>, vector<8x32xbf16>, vector<8x32xf32> -> vector<8x32xf32>
    %88 = arith.addf %64, %87 : vector<8x32xf32>
    %89 = vector.extract_strided_slice %34 {offsets = [0, 16], sizes = [8, 8], strides = [1, 1]} : vector<8x32xbf16> to vector<8x8xbf16>
    %c2 = arith.constant 2 : index
    %c0_46 = arith.constant 0 : index
    %c0_47 = arith.constant 0 : index
    %90 = vector.load %arg11[%c2, %c0_46, %c0_47] : memref<4x8x8xbf16, #tpu.memory_space<vmem>>, vector<1x8x8xbf16>
    %91 = vector.shape_cast %90 : vector<1x8x8xbf16> to vector<8x8xbf16>
    %c2_48 = arith.constant 2 : index
    %c0_49 = arith.constant 0 : index
    %c0_50 = arith.constant 0 : index
    %92 = vector.load %arg12[%c2_48, %c0_49, %c0_50] : memref<4x8x8xbf16, #tpu.memory_space<vmem>>, vector<1x8x8xbf16>
    %93 = vector.shape_cast %92 : vector<1x8x8xbf16> to vector<8x8xbf16>
    %cst_51 = arith.constant dense<0.000000e+00> : vector<8x8xf32>
    %94 = tpu.matmul %89, %91, %cst_51 {dimension_numbers = #tpu.dot_dimension_numbers<[1], [1], [0], [0], [0, 0, 1, 0], [], []>} : vector<8x8xbf16>, vector<8x8xbf16>, vector<8x8xf32> -> vector<8x8xf32>
    %cst_52 = arith.constant -1.000000e+09 : f32
    %95 = vector.broadcast %cst_52 : f32 to vector<8x8xf32>
    %96 = arith.select %39, %95, %94 : vector<8x8xi1>, vector<8x8xf32>
    %cst_53 = arith.constant dense<0xFF800000> : vector<8xf32>
    %97 = vector.multi_reduction <maximumf>, %96, %cst_53 [1] : vector<8x8xf32> to vector<8xf32>
    %98 = vector.shape_cast %97 : vector<8xf32> to vector<8x1xf32>
    %99 = vector.broadcast %98 : vector<8x1xf32> to vector<8x8xf32>
    %100 = arith.subf %96, %99 : vector<8x8xf32>
    %101 = math.exp %100 : vector<8x8xf32>
    %cst_54 = arith.constant dense<0.000000e+00> : vector<8xf32>
    %102 = vector.multi_reduction <add>, %101, %cst_54 [1] : vector<8x8xf32> to vector<8xf32>
    %103 = vector.shape_cast %102 : vector<8xf32> to vector<8x1xf32>
    %104 = tpu.reciprocal %103 {approx = true} : vector<8x1xf32> -> vector<8x1xf32>
    %105 = vector.broadcast %104 : vector<8x1xf32> to vector<8x8xf32>
    %106 = arith.mulf %101, %105 : vector<8x8xf32>
    %107 = arith.truncf %106 : vector<8x8xf32> to vector<8x8xbf16>
    %cst_55 = arith.constant dense<0.000000e+00> : vector<8x8xf32>
    %108 = tpu.matmul %107, %93, %cst_55 {dimension_numbers = #tpu.dot_dimension_numbers<[1], [0], [0], [1], [0, 0, 1, 1], [], []>} : vector<8x8xbf16>, vector<8x8xbf16>, vector<8x8xf32> -> vector<8x8xf32>
    %109 = arith.truncf %108 : vector<8x8xf32> to vector<8x8xbf16>
    %c16 = arith.constant 16 : index
    %c0_56 = arith.constant 0 : index
    %110 = vector.load %arg9[%c16, %c0_56] : memref<32x32xbf16, #tpu.memory_space<vmem>>, vector<8x32xbf16>
    %cst_57 = arith.constant dense<0.000000e+00> : vector<8x32xf32>
    %111 = tpu.matmul %109, %110, %cst_57 {dimension_numbers = #tpu.dot_dimension_numbers<[1], [0], [0], [1], [0, 0, 1, 1], [], []>} : vector<8x8xbf16>, vector<8x32xbf16>, vector<8x32xf32> -> vector<8x32xf32>
    %112 = arith.addf %88, %111 : vector<8x32xf32>
    %113 = vector.extract_strided_slice %34 {offsets = [0, 24], sizes = [8, 8], strides = [1, 1]} : vector<8x32xbf16> to vector<8x8xbf16>
    %c3 = arith.constant 3 : index
    %c0_58 = arith.constant 0 : index
    %c0_59 = arith.constant 0 : index
    %114 = vector.load %arg11[%c3, %c0_58, %c0_59] : memref<4x8x8xbf16, #tpu.memory_space<vmem>>, vector<1x8x8xbf16>
    %115 = vector.shape_cast %114 : vector<1x8x8xbf16> to vector<8x8xbf16>
    %c3_60 = arith.constant 3 : index
    %c0_61 = arith.constant 0 : index
    %c0_62 = arith.constant 0 : index
    %116 = vector.load %arg12[%c3_60, %c0_61, %c0_62] : memref<4x8x8xbf16, #tpu.memory_space<vmem>>, vector<1x8x8xbf16>
    %117 = vector.shape_cast %116 : vector<1x8x8xbf16> to vector<8x8xbf16>
    %cst_63 = arith.constant dense<0.000000e+00> : vector<8x8xf32>
    %118 = tpu.matmul %113, %115, %cst_63 {dimension_numbers = #tpu.dot_dimension_numbers<[1], [1], [0], [0], [0, 0, 1, 0], [], []>} : vector<8x8xbf16>, vector<8x8xbf16>, vector<8x8xf32> -> vector<8x8xf32>
    %cst_64 = arith.constant -1.000000e+09 : f32
    %119 = vector.broadcast %cst_64 : f32 to vector<8x8xf32>
    %120 = arith.select %39, %119, %118 : vector<8x8xi1>, vector<8x8xf32>
    %cst_65 = arith.constant dense<0xFF800000> : vector<8xf32>
    %121 = vector.multi_reduction <maximumf>, %120, %cst_65 [1] : vector<8x8xf32> to vector<8xf32>
    %122 = vector.shape_cast %121 : vector<8xf32> to vector<8x1xf32>
    %123 = vector.broadcast %122 : vector<8x1xf32> to vector<8x8xf32>
    %124 = arith.subf %120, %123 : vector<8x8xf32>
    %125 = math.exp %124 : vector<8x8xf32>
    %cst_66 = arith.constant dense<0.000000e+00> : vector<8xf32>
    %126 = vector.multi_reduction <add>, %125, %cst_66 [1] : vector<8x8xf32> to vector<8xf32>
    %127 = vector.shape_cast %126 : vector<8xf32> to vector<8x1xf32>
    %128 = tpu.reciprocal %127 {approx = true} : vector<8x1xf32> -> vector<8x1xf32>
    %129 = vector.broadcast %128 : vector<8x1xf32> to vector<8x8xf32>
    %130 = arith.mulf %125, %129 : vector<8x8xf32>
    %131 = arith.truncf %130 : vector<8x8xf32> to vector<8x8xbf16>
    %cst_67 = arith.constant dense<0.000000e+00> : vector<8x8xf32>
    %132 = tpu.matmul %131, %117, %cst_67 {dimension_numbers = #tpu.dot_dimension_numbers<[1], [0], [0], [1], [0, 0, 1, 1], [], []>} : vector<8x8xbf16>, vector<8x8xbf16>, vector<8x8xf32> -> vector<8x8xf32>
    %133 = arith.truncf %132 : vector<8x8xf32> to vector<8x8xbf16>
    %c24 = arith.constant 24 : index
    %c0_68 = arith.constant 0 : index
    %134 = vector.load %arg9[%c24, %c0_68] : memref<32x32xbf16, #tpu.memory_space<vmem>>, vector<8x32xbf16>
    %cst_69 = arith.constant dense<0.000000e+00> : vector<8x32xf32>
    %135 = tpu.matmul %133, %134, %cst_69 {dimension_numbers = #tpu.dot_dimension_numbers<[1], [0], [0], [1], [0, 0, 1, 1], [], []>} : vector<8x8xbf16>, vector<8x32xbf16>, vector<8x32xf32> -> vector<8x32xf32>
    %136 = arith.addf %112, %135 : vector<8x32xf32>
    %137 = arith.addf %4, %136 : vector<8x32xf32>
    %c0_70 = arith.constant 0 : index
    %c0_71 = arith.constant 0 : index
    %c0_72 = arith.constant 0 : index
    %138 = vector.load %arg10[%c0_70, %c0_71, %c0_72] : memref<1x8x32xf32, #tpu.memory_space<vmem>>, vector<1x8x32xf32>
    %139 = vector.shape_cast %138 : vector<1x8x32xf32> to vector<8x32xf32>
    %140 = vector.shape_cast %137 : vector<8x32xf32> to vector<1x8x32xf32>
    tpu.vector_store %arg10[%c0_70, %c0_71, %c0_72], %140 {strides = array<i32>} : memref<1x8x32xf32, #tpu.memory_space<vmem>>, vector<1x8x32xf32>,
    return
  }
  func.func @transform_0(%arg0: i32, %arg1: i32) -> (i32, i32, i32) {
    %c0_i32 = arith.constant 0 : i32
    %c0_i32_0 = arith.constant 0 : i32
    return %arg0, %arg1, %c0_i32 : i32, i32, i32
  }
  func.func @transform_1(%arg0: i32, %arg1: i32) -> (i32, i32, i32) {
    %c0_i32 = arith.constant 0 : i32
    %c0_i32_0 = arith.constant 0 : i32
    %c0_i32_1 = arith.constant 0 : i32
    return %arg0, %c0_i32, %c0_i32_0 : i32, i32, i32
  }
  func.func @transform_2(%arg0: i32, %arg1: i32) -> (i32, i32, i32) {
    %c0_i32 = arith.constant 0 : i32
    %c0_i32_0 = arith.constant 0 : i32
    return %arg0, %arg1, %c0_i32 : i32, i32, i32
  }
  func.func @transform_3(%arg0: i32, %arg1: i32) -> (i32, i32) {
    %c0_i32 = arith.constant 0 : i32
    %c0_i32_0 = arith.constant 0 : i32
    %c0_i32_1 = arith.constant 0 : i32
    return %c0_i32, %c0_i32_0 : i32, i32
  }
  func.func @transform_4(%arg0: i32, %arg1: i32) -> (i32, i32) {
    %c0_i32 = arith.constant 0 : i32
    %c0_i32_0 = arith.constant 0 : i32
    %c0_i32_1 = arith.constant 0 : i32
    return %c0_i32, %c0_i32_0 : i32, i32
  }
  func.func @transform_5(%arg0: i32, %arg1: i32) -> (i32, i32) {
    %c0_i32 = arith.constant 0 : i32
    %c0_i32_0 = arith.constant 0 : i32
    %c0_i32_1 = arith.constant 0 : i32
    return %c0_i32, %c0_i32_0 : i32, i32
  }
  func.func @transform_6(%arg0: i32, %arg1: i32) -> (i32, i32) {
    %c0_i32 = arith.constant 0 : i32
    %c0_i32_0 = arith.constant 0 : i32
    %c0_i32_1 = arith.constant 0 : i32
    return %c0_i32, %c0_i32_0 : i32, i32
  }
  func.func @transform_7(%arg0: i32, %arg1: i32) -> (i32, i32) {
    %c0_i32 = arith.constant 0 : i32
    %c0_i32_0 = arith.constant 0 : i32
    %c0_i32_1 = arith.constant 0 : i32
    return %c0_i32, %c0_i32_0 : i32, i32
  }
  func.func @transform_8(%arg0: i32, %arg1: i32) -> (i32, i32, i32) {
    %c0_i32 = arith.constant 0 : i32
    %c0_i32_0 = arith.constant 0 : i32
    return %arg0, %arg1, %c0_i32 : i32, i32, i32
  }
}

module attributes {stable_mosaic.version = 11 : i64} {
  func.func @ffn_block_kernel(%arg0: i32, %arg1: i32, %arg2: memref<1x8x32xf32, #tpu.memory_space<vmem>>, %arg3: memref<1x32xf32, #tpu.memory_space<vmem>>, %arg4: memref<1x32xf32, #tpu.memory_space<vmem>>, %arg5: memref<32x64xbf16, #tpu.memory_space<vmem>>, %arg6: memref<1x64xf32, #tpu.memory_space<vmem>>, %arg7: memref<64x32xbf16, #tpu.memory_space<vmem>>, %arg8: memref<1x32xf32, #tpu.memory_space<vmem>>, %arg9: memref<1x8x32xf32, #tpu.memory_space<vmem>>) attributes {dimension_semantics = [#tpu.dimension_semantics<parallel>, #tpu.dimension_semantics<parallel>], iteration_bounds = array<i64: 2, 1>, scalar_prefetch = 0 : i64, scratch_operands = 0 : i64, tpu.core_type = #tpu.core_type<tc>, window_params = [{transform_indices = @transform_0, window_bounds = array<i64: 1, 8, 32>}, {pipeline_mode = #tpu.pipeline_mode<synchronous>, transform_indices = @transform_1, window_bounds = array<i64: 1, 32>}, {pipeline_mode = #tpu.pipeline_mode<synchronous>, transform_indices = @transform_2, window_bounds = array<i64: 1, 32>}, {pipeline_mode = #tpu.pipeline_mode<synchronous>, transform_indices = @transform_3, window_bounds = array<i64: 32, 64>}, {pipeline_mode = #tpu.pipeline_mode<synchronous>, transform_indices = @transform_4, window_bounds = array<i64: 1, 64>}, {pipeline_mode = #tpu.pipeline_mode<synchronous>, transform_indices = @transform_5, window_bounds = array<i64: 64, 32>}, {pipeline_mode = #tpu.pipeline_mode<synchronous>, transform_indices = @transform_6, window_bounds = array<i64: 1, 32>}, {transform_indices = @transform_7, window_bounds = array<i64: 1, 8, 32>}]} {
    %c0 = arith.constant 0 : index
    %c0_0 = arith.constant 0 : index
    %c0_1 = arith.constant 0 : index
    %0 = vector.load %arg2[%c0, %c0_0, %c0_1] : memref<1x8x32xf32, #tpu.memory_space<vmem>>, vector<1x8x32xf32>
    %1 = vector.shape_cast %0 : vector<1x8x32xf32> to vector<8x32xf32>
    %c0_2 = arith.constant 0 : index
    %c0_3 = arith.constant 0 : index
    %2 = vector.load %arg3[%c0_2, %c0_3] : memref<1x32xf32, #tpu.memory_space<vmem>>, vector<1x32xf32>
    %c0_4 = arith.constant 0 : index
    %c0_5 = arith.constant 0 : index
    %3 = vector.load %arg4[%c0_4, %c0_5] : memref<1x32xf32, #tpu.memory_space<vmem>>, vector<1x32xf32>
    %cst = arith.constant dense<0.000000e+00> : vector<8xf32>
    %4 = vector.multi_reduction <add>, %1, %cst [1] : vector<8x32xf32> to vector<8xf32>
    %5 = vector.shape_cast %4 : vector<8xf32> to vector<8x1xf32>
    %cst_6 = arith.constant 3.200000e+01 : f32
    %6 = vector.broadcast %cst_6 : f32 to vector<8x1xf32>
    %7 = arith.divf %5, %6 : vector<8x1xf32>
    %8 = vector.broadcast %7 : vector<8x1xf32> to vector<8x32xf32>
    %9 = arith.subf %1, %8 : vector<8x32xf32>
    %10 = arith.mulf %9, %9 : vector<8x32xf32>
    %cst_7 = arith.constant dense<0.000000e+00> : vector<8xf32>
    %11 = vector.multi_reduction <add>, %10, %cst_7 [1] : vector<8x32xf32> to vector<8xf32>
    %12 = vector.shape_cast %11 : vector<8xf32> to vector<8x1xf32>
    %cst_8 = arith.constant 3.100000e+01 : f32
    %13 = vector.broadcast %cst_8 : f32 to vector<8x1xf32>
    %14 = arith.divf %12, %13 : vector<8x1xf32>
    %15 = vector.broadcast %7 : vector<8x1xf32> to vector<8x32xf32>
    %16 = arith.subf %1, %15 : vector<8x32xf32>
    %17 = vector.broadcast %2 : vector<1x32xf32> to vector<8x32xf32>
    %18 = arith.mulf %17, %16 : vector<8x32xf32>
    %19 = math.sqrt %14 : vector<8x1xf32>
    %cst_9 = arith.constant 9.99999997E-7 : f32
    %20 = vector.broadcast %cst_9 : f32 to vector<8x1xf32>
    %21 = arith.addf %19, %20 : vector<8x1xf32>
    %22 = vector.broadcast %21 : vector<8x1xf32> to vector<8x32xf32>
    %23 = arith.divf %18, %22 : vector<8x32xf32>
    %24 = vector.broadcast %3 : vector<1x32xf32> to vector<8x32xf32>
    %25 = arith.addf %23, %24 : vector<8x32xf32>
    %26 = arith.truncf %25 : vector<8x32xf32> to vector<8x32xbf16>
    %c0_10 = arith.constant 0 : index
    %c0_11 = arith.constant 0 : index
    %27 = vector.load %arg5[%c0_10, %c0_11] : memref<32x64xbf16, #tpu.memory_space<vmem>>, vector<32x64xbf16>
    %cst_12 = arith.constant dense<0.000000e+00> : vector<8x64xf32>
    %28 = tpu.matmul %26, %27, %cst_12 {dimension_numbers = #tpu.dot_dimension_numbers<[1], [0], [0], [1], [0, 0, 1, 1], [], []>} : vector<8x32xbf16>, vector<32x64xbf16>, vector<8x64xf32> -> vector<8x64xf32>
    %c0_13 = arith.constant 0 : index
    %c0_14 = arith.constant 0 : index
    %29 = vector.load %arg6[%c0_13, %c0_14] : memref<1x64xf32, #tpu.memory_space<vmem>>, vector<1x64xf32>
    %30 = vector.broadcast %29 : vector<1x64xf32> to vector<8x64xf32>
    %31 = arith.addf %28, %30 : vector<8x64xf32>
    %cst_15 = arith.constant 0.000000e+00 : f32
    %32 = vector.broadcast %cst_15 : f32 to vector<8x64xf32>
    %33 = arith.maximumf %31, %32 : vector<8x64xf32>
    %34 = arith.truncf %33 : vector<8x64xf32> to vector<8x64xbf16>
    %c0_16 = arith.constant 0 : index
    %c0_17 = arith.constant 0 : index
    %35 = vector.load %arg7[%c0_16, %c0_17] : memref<64x32xbf16, #tpu.memory_space<vmem>>, vector<64x32xbf16>
    %cst_18 = arith.constant dense<0.000000e+00> : vector<8x32xf32>
    %36 = tpu.matmul %34, %35, %cst_18 {dimension_numbers = #tpu.dot_dimension_numbers<[1], [0], [0], [1], [0, 0, 1, 1], [], []>} : vector<8x64xbf16>, vector<64x32xbf16>, vector<8x32xf32> -> vector<8x32xf32>
    %c0_19 = arith.constant 0 : index
    %c0_20 = arith.constant 0 : index
    %37 = vector.load %arg8[%c0_19, %c0_20] : memref<1x32xf32, #tpu.memory_space<vmem>>, vector<1x32xf32>
    %38 = vector.broadcast %37 : vector<1x32xf32> to vector<8x32xf32>
    %39 = arith.addf %36, %38 : vector<8x32xf32>
    %40 = arith.addf %1, %39 : vector<8x32xf32>
    %c0_21 = arith.constant 0 : index
    %c0_22 = arith.constant 0 : index
    %c0_23 = arith.constant 0 : index
    %41 = vector.load %arg9[%c0_21, %c0_22, %c0_23] : memref<1x8x32xf32, #tpu.memory_space<vmem>>, vector<1x8x32xf32>
    %42 = vector.shape_cast %41 : vector<1x8x32xf32> to vector<8x32xf32>
    %43 = vector.shape_cast %40 : vector<8x32xf32> to vector<1x8x32xf32>
    tpu.vector_store %arg9[%c0_21, %c0_22, %c0_23], %43 {strides = array<i32>} : memref<1x8x32xf32, #tpu.memory_space<vmem>>, vector<1x8x32xf32>,
    return
  }
  func.func @transform_0(%arg0: i32, %arg1: i32) -> (i32, i32, i32) {
    %c0_i32 = arith.constant 0 : i32
    %c0_i32_0 = arith.constant 0 : i32
    return %arg0, %arg1, %c0_i32 : i32, i32, i32
  }
  func.func @transform_1(%arg0: i32, %arg1: i32) -> (i32, i32) {
    %c0_i32 = arith.constant 0 : i32
    %c0_i32_0 = arith.constant 0 : i32
    %c0_i32_1 = arith.constant 0 : i32
    return %c0_i32, %c0_i32_0 : i32, i32
  }
  func.func @transform_2(%arg0: i32, %arg1: i32) -> (i32, i32) {
    %c0_i32 = arith.constant 0 : i32
    %c0_i32_0 = arith.constant 0 : i32
    %c0_i32_1 = arith.constant 0 : i32
    return %c0_i32, %c0_i32_0 : i32, i32
  }
  func.func @transform_3(%arg0: i32, %arg1: i32) -> (i32, i32) {
    %c0_i32 = arith.constant 0 : i32
    %c0_i32_0 = arith.constant 0 : i32
    %c0_i32_1 = arith.constant 0 : i32
    return %c0_i32, %c0_i32_0 : i32, i32
  }
  func.func @transform_4(%arg0: i32, %arg1: i32) -> (i32, i32) {
    %c0_i32 = arith.constant 0 : i32
    %c0_i32_0 = arith.constant 0 : i32
    %c0_i32_1 = arith.constant 0 : i32
    return %c0_i32, %c0_i32_0 : i32, i32
  }
  func.func @transform_5(%arg0: i32, %arg1: i32) -> (i32, i32) {
    %c0_i32 = arith.constant 0 : i32
    %c0_i32_0 = arith.constant 0 : i32
    %c0_i32_1 = arith.constant 0 : i32
    return %c0_i32, %c0_i32_0 : i32, i32
  }
  func.func @transform_6(%arg0: i32, %arg1: i32) -> (i32, i32) {
    %c0_i32 = arith.constant 0 : i32
    %c0_i32_0 = arith.constant 0 : i32
    %c0_i32_1 = arith.constant 0 : i32
    return %c0_i32, %c0_i32_0 : i32, i32
  }
  func.func @transform_7(%arg0: i32, %arg1: i32) -> (i32, i32, i32) {
    %c0_i32 = arith.constant 0 : i32
    %c0_i32_0 = arith.constant 0 : i32
    return %arg0, %arg1, %c0_i32 : i32, i32, i32
  }
}

</mosaic_0001>

<bundles_post_ra>
// kernel: decoder_block.5
= control target key start
LH: loop header
LB: loop body
LE: loop exit
PB: predicated region body
PF: predicated region fallthrough
CT: control target
= control target key end

     0   :  { %12 = vsyncpa [#allocation3], 0  ;;  %s972_s0 = inlined_call_operand.vmem [shape: f32[2,8,32], index: 0, kind: input, shape index: {}]   ;;  %s973_s1 = inlined_call_operand.vmem [shape: f32[1,32], index: 1, kind: input, shape index: {}]   ;;  %s974_s2 = inlined_call_operand.vmem [shape: f32[1,32], index: 2, kind: input, shape index: {}]   ;;  %s975_s3 = inlined_call_operand.vmem [shape: bf16[32,64], index: 3, kind: input, shape index: {}]   ;;  %s976_s4 = inlined_call_operand.vmem [shape: f32[1,64], index: 4, kind: input, shape index: {}]   ;;  %s977_s5 = inlined_call_operand.vmem [shape: bf16[64,32], index: 5, kind: input, shape index: {}]   ;;  %s978_s6 = inlined_call_operand.vmem [shape: f32[1,32], index: 6, kind: input, shape index: {}]   ;;  %s979_s7 = inlined_call_operand.hbm [shape: f32[2,8,32], index: 7, kind: output, shape index: {}]  }
   0x1   :  { %14 = vsyncpa [#allocation3 + $0x1], 0  ;;  %s821_s24 = smov 0   ;;  %s823_s25 = smov 0  }
   0x2   :  { %s825_s26 = smov 0   ;;  %s827_s27 = smov 0  }
   0x3   :  { %s829_s28 = smov 0   ;;  %s831_s29 = smov 0  }
   0x4 LB: > { %s580_s30 = sadd.s32 4294967295, %s776_s29   ;;  %s581_s8 = sadd.s32 4294967294, %s776_s29   ;;  %s776_s29 = sphi %s831_s29, %s20_s29   ;;  %s772_s28 = sphi %s829_s28, %s986_s28   ;;  %s768_s27 = sphi %s827_s27, %s985_s27   ;;  %s764_s26 = sphi %s825_s26, %s984_s26   ;;  %s760_s25 = sphi %s823_s25, %s983_s25   ;;  %s756_s24 = sphi %s821_s24, %s982_s24  }
   0x5   : > { %s32_s9 = sadd.s32 1, %s772_s28  ;;  %s195_s10 = sadd.s32 1, %s764_s26 }
   0x6   : > { %p34_p0 = scmp.ge.s32.totalorder %s32_s9, 2  ;;  %p205_p1 = scmp.ne.s32.totalorder %s764_s26, %s760_s25 }
   0x7   : > { %p206_p2 = scmp.eq.s32.totalorder %s580_s30, 1  ;;  %p211_p3 = scmp.ne.s32.totalorder %s760_s25, %s756_s24 }
   0x8   : > { %s988_s9 = smov (%p34_p0, %s32_s9), 0  ;;  %p212_p5 = scmp.eq.s32.totalorder %s581_s8, 1 }
   0x9   : > { %p861_p4 = por %p206_p2, %p205_p1  ;;  %s190_s12 = ssub.s32 %s772_s28, %s988_s9 }
   0xa   : > { %p584_p6 = scmp.ge.s32.totalorder %s776_s29, 1  ;;  %p193_p7 = scmp.eq.s32.totalorder %s190_s12, 0 }
   0xb   : > { %p868_p8 = por %p212_p5, %p211_p3  ;;  %p258_p9 = scmp.lt.s32.totalorder %s776_s29, 3 }
   0xc   : > { %s874_s14 = scalar_select %p193_p7, %s764_s26, %s195_s10  }
   0xd   : > { %p259_p10 = pnand %p584_p6, %p258_p9 }
   0xe   : > { %p292_p11 = scmp.lt.s32.totalorder (!%p259_p10), %s768_s27, 1  ;;  %vm303_vm0 = vcmask (!%p259_p10), 261120   ;;  %v688_v7 = vld [vmem:[%s975_s3] sm:$0xff] (!%p259_p10)   ;;  %v778_v8 = vmov (!%p259_p10), 0.0   ;;  %vm779_vm1 = vmmov (!%p259_p10), 0   ;;  %v689_v9 = vld [vmem:[%s975_s3 + $0x8] sm:$0xff] (!%p259_p10)  }
   0xf   : > { %262 = sbr.rel (%p259_p10) target bundleno = 803 (0x323), region = 48  ;;  %611 = vmatprep.subr.bf16.mxu0 (!%p259_p10), %v778_v8  ;;  %615 = vmatprep.mubr.msk.bf16.mxu0 (!%p259_p10), %vm779_vm1, %v778_v8  ;;  %v690_v10 = vld [vmem:[%s977_s5] sm:$0xff] (!%p259_p10)   ;;  %v691_v11 = vld [vmem:[%s977_s5 + $0x8] sm:$0xff] (!%p259_p10)   ;;  %v692_v27 = vld [vmem:[%s977_s5 + $0x10] sm:$0xff] (!%p259_p10)   ;;  %vm448_vm4 = vcmask (!%p259_p10), 523264   ;;  %s289_s8 = sand.u32 (!%p259_p10), 1, %s760_s25  }
  0x10   : > { %612 = vmatpush3.bf16.msra.mxu0 (!%p259_p10), %v688_v7  ;;  %619 = vmatprep.subr.bf16.mxu1 (!%p259_p10), %v778_v8  ;;  %v587_v20 = vld [vmem:[%s973_s1] ss:$0 sm:$0xff] (!%p259_p10)  ;;  %v693_v28 = vld [vmem:[%s977_s5 + $0x18] sm:$0xff] (!%p259_p10)   ;;  %s585_s10 = sshll.u32 (!%p259_p10), %s289_s8, 3  ;;  %s780_s23 = smov (!%p259_p10), [#allocation2]  }
  0x11   : > { %613 = vmatprep.subr.bf16.mxu0 (!%p259_p10), %v778_v8  ;;  %627 = vmatprep.mubr.msk.bf16.mxu1 (!%p259_p10), %vm779_vm1, %v778_v8  ;;  %v588_v23 = vld [vmem:[%s974_s2] ss:$0 sm:$0xff] (!%p259_p10)  ;;  %s291_s17 = scalar_lea.vmem (!%p259_p10), [#allocation2], %s585_s10  ;;  %s702_s30 = sshll.u32 (!%p259_p10), %s780_s23, 4  ;;  %s703_s30 = int_to_ptr.vmem [resolvable:$false] %s702_s30 }
  0x12   : > { %620 = vmatpush3.bf16.msra.mxu1 (!%p259_p10), %v690_v10  ;;  %v589_v29 = vld [vmem:[%s976_s4] ss:$0 sm:$0xff] (!%p259_p10)  ;;  %s509_s18 = sshll.u32 (!%p259_p10), %s291_s17, 4  ;;  %s704_s10 = scalar_lea.vmem (!%p259_p10), %s703_s30, 256  ;;  %s926_s18 = int_to_ptr.vmem [resolvable:$true] %s509_s18 }
  0x13   : > { %621 = vmatprep.subr.bf16.mxu1 (!%p259_p10), %v778_v8  ;;  %v593_v37 = vld [vmem:[%s978_s6] ss:$0 sm:$0xff] (!%p259_p10)  ;;  %s698_s22 = scalar_lea.vmem (!%p259_p10), %s926_s18, 128  ;;  %p705_p1 = scmp.lt.s32.totalorder (!%p259_p10), %s926_s18, %s703_s30 }
  0x14   : > { %614 = vmatpush3.bf16.msra.mxu0 (!%p259_p10), %v689_v9  ;;  %p699_p12 = scmp.ne.s32.totalorder (!%p259_p10), %s926_s18, %s698_s22  ;;  %p706_p2 = scmp.lt.s32.totalorder (!%p259_p10), %s704_s10, %s698_s22 }
  0x16   : > { %s293_s15 = scalar_select %p292_p11, %s768_s27, 1  ;;  %622 = vmatpush3.bf16.msra.mxu1 %v691_v11 }
  0x17   : > { %623 = vmatprep.subr.bf16.mxu1 %v778_v8  ;;  %p700_p13 = pnand %p699_p12, %p861_p4  ;;  %p707_p3 = por %p706_p2, %p705_p1 }
  0x18   : > { %s586_s16 = sshll.u32 %s293_s15, 3 }
  0x19   : > { %s298_s19 = scalar_lea.vmem %s972_s0, %s586_s16  ;;  %s600_s16 = sshll.u32 %s768_s27, 7 }
  0x1a   : > { %v881_v0 = vld [vmem:[%s298_s19] sm:$0xff]  ;;  %624 = vmatpush3.bf16.msra.mxu1 %v692_v27  ;;  %s924_s21 = scalar_lea.hbm %s979_s7, %s600_s16  ;;  %s495_s27 = scalar_lea.sflag [#allocation3], %s289_s8 }
  0x1b   : > { %v304_v1 = vsel %vm303_vm0, %v881_v0, 0.0  ;;  %625 = vmatprep.subr.bf16.mxu1 %v778_v8  ;;  %p701_p0 = pneg %p700_p13 }
  0x1c   : > { %305 = vadd.xlane.f32.xlu0 %v304_v1 }
  0x1d   : > { %p708_p5 = pnand %p707_p3, %p701_p0 }
  0x1e   : > { %626 = vmatpush3.bf16.msra.mxu1 %v693_v28 }
  0xa9   : > { %v306_v2 = vpop.xlane.xlu0 %305 }
  0xaa   : > { %v308_v3 = vmul.f32 0.03125, %v306_v2 }
  0xac   : > { %v309_v4 = vsub.f32 %v881_v0, %v308_v3 }
  0xae   : > { %v310_v5 = vmul.f32 %v309_v4, %v309_v4  ;;  %v322_v21 = vmul.f32 %v587_v20, %v309_v4 }
  0xb0   : > { %v311_v6 = vsel %vm303_vm0, %v310_v5, 0.0 }
  0xb1   : > { %312 = vadd.xlane.f32.xlu0 %v311_v6 }
 0x13e   : > { %v313_v12 = vpop.xlane.xlu0 %312 }
 0x13f   : > { %v315_v13 = vmul.f32 0.032258064, %v313_v12 }
 0x141   : > { %694 = vrsqrt.f32 %v315_v13  ;;  %vm325_vm2 = vcmp.eq.f32.partialorder %v315_v13, inf  ;;  %v328_v16 = vand.u32 2147483648, %v315_v13  ;;  %vm327_vm3 = vcmp.eq.f32.partialorder %v315_v13, 0.0 }
 0x14b   : > { %v695_v14 = vpop.eup %694 }
 0x14c   : > { %v324_v15 = vmul.f32 %v695_v14, %v315_v13 }
 0x14e   : > { %v326_v17 = vsel %vm325_vm2, %v315_v13, %v324_v15 }
 0x14f   : > { %v329_v18 = vsel %vm327_vm3, %v328_v16, %v326_v17 }
 0x150   : > { %v330_v19 = vadd.f32 1e-06, %v329_v18 }
 0x152   : > { %696 = vrcp.f32 %v330_v19 }
 0x15c   : > { %v697_v22 = vpop.eup %696 }
 0x15d   : > { %v332_v24 = vmul.f32 %v697_v22, %v322_v21 }
 0x15f   : > { %v339_v25 = vadd.f32 %v588_v23, %v332_v24 }
 0x161   : > { %v340_v26 = vpack.c.bf16 %v339_v25, %v339_v25 }
 0x163   : > { %616 = vmatmul.mubr.msk.bf16.vlgmr.msra.gmra.mrb[0].mxu0 %vm303_vm0, %v340_v26 }
 0x236   : > { %v401_v30 = vpop.f32.mrb[0].mxu0 }
 0x237   : > { %v402_v31 = vadd.f32 %v589_v29, %v401_v30  ;;  %v617_v32 = vpop.f32.mrb[1].mxu0 }
 0x238   : > { %v404_v33 = vpop.f32.mrb[2].mxu0 }
 0x239   : > { %v407_v34 = vmax.f32 %v402_v31, 0.0  ;;  %v618_v35 = vpop.f32.mrb[3].mxu0 }
 0x23b   : > { %v408_v36 = vpack.c.bf16 %v407_v34, %v407_v34 }
 0x23d   : > { %628 = vmatmul.mubr.msk.bf16.vlgmr.msra.gmra.mrb[0].mxu1 %vm448_vm4, %v408_v36 }
 0x310   : > { %v486_v38 = vpop.f32.mrb[0].mxu1 }
 0x311   : > { %v487_v39 = vadd.f32 %v593_v37, %v486_v38  ;;  %v629_v40 = vpop.f32.mrb[1].mxu1 }
 0x312   : > { %v489_v41 = vpop.f32.mrb[2].mxu1 }
 0x313   : > { %v492_v42 = vadd.f32 %v487_v39, %v881_v0  ;;  %v630_v43 = vpop.f32.mrb[3].mxu1 }
 0x315   : > { %493 = vst.msk [vmem:[%s291_s17] sm:$0xff] %vm303_vm0, %v492_v42 }
 0x316   : > { %711 = shalt.err (!%p708_p5)
}
 0x317   : > { %s712_s8 = scalar_lea.hbm %s924_s21, 128  ;;  %s716_s16 = scalar_lea.hbm %s979_s7, 256 }
 0x318   : > { %p713_p6 = scmp.ne.s32.totalorder %s924_s21, %s712_s8  ;;  %p717_p10 = scmp.lt.u32.totalorder %s924_s21, %s979_s7 }
 0x319   : > { %p718_p11 = scmp.lt.u32.totalorder %s716_s16, %s712_s8  ;;  %p720_p13 = scmp.lt.u32.totalorder %s712_s8, %s924_s21 }
 0x31a   : > { %p714_p7 = pnand %p713_p6, %p861_p4 }
 0x31b   : > { %p719_p12 = por %p718_p11, %p717_p10 }
 0x31c   : > { %p715_p9 = pneg %p714_p7 }
 0x31d   : > { %p721_p0 = por %p720_p13, %p719_p12 }
 0x31f   : > { %p722_p1 = pnand %p721_p0, %p715_p9 }
 0x321   : > { %725 = shalt.err (!%p722_p1)
}
 0x322   : > { %631 = dma.vmem_to_hbm [thread:$0]  (%p861_p4), %s926_s18, 128, %s924_s21, %s495_s27  }
 0x323 PF: > { %p637_p2 = scmp.ge.s32.totalorder %s776_s29, 2  ;;  %s521_s20 = sand.u32 1, %s756_s24  }
 0x324   : > { %s522_s22 = scalar_lea.sflag [#allocation3], %s521_s20 }
 0x325   : > { %p634_p3 = pnand %p637_p2, %p868_p8 }
 0x327   : > { %751 = dma.done.wait (!%p634_p3), %s522_s22, 128  }
 0x328   : > { %753 = vsyncadd (!%p634_p3), %s522_s22, 4294967168  ;;  %s20_s29 = sadd.s32 1, %s776_s29   ;;  %s982_s24 = smov %s760_s25 }
 0x329   : > { %p17_p5 = scmp.ge.s32.totalorder %s20_s29, 4   ;;  %s983_s25 = smov %s764_s26 }
 0x32a   : > { %s984_s26 = smov %s874_s14  ;;  %s985_s27 = smov %s772_s28 }
 0x32b   : > { %s986_s28 = smov %s988_s9  ;;  %19 = sbr.rel (!%p17_p5) target bundleno = 4 (0x4), region = 83 }
 0x332   :  { %527 = vsyncpa [#allocation3], 1 }
 0x333   :  { %529 = vsyncpa [#allocation3 + $0x1], 1 }

// kernel: decoder_block.4
= control target key start
LH: loop header
LB: loop body
LE: loop exit
PB: predicated region body
PF: predicated region fallthrough
CT: control target
= control target key end

     0   :  { %s1615_s27 = smov 0   ;;  %s1617_s28 = smov 0   ;;  %s1818_s0 = inlined_call_operand.vmem [shape: f32[2,8,32], index: 0, kind: input, shape index: {}]   ;;  %s1819_s1 = inlined_call_operand.vmem [shape: f32[2,8,32], index: 1, kind: input, shape index: {}]   ;;  %s1820_s2 = inlined_call_operand.vmem [shape: s8[2,8,8], index: 2, kind: input, shape index: {}]   ;;  %s1821_s3 = inlined_call_operand.vmem [shape: f32[1,32], index: 3, kind: input, shape index: {}]   ;;  %s1822_s4 = inlined_call_operand.vmem [shape: f32[1,32], index: 4, kind: input, shape index: {}]   ;;  %s1823_s5 = inlined_call_operand.vmem [shape: bf16[32,32], index: 5, kind: input, shape index: {}]   ;;  %s1824_s6 = inlined_call_operand.vmem [shape: bf16[32,64], index: 6, kind: input, shape index: {}]   ;;  %s1825_s7 = inlined_call_operand.vmem [shape: bf16[32,32], index: 7, kind: input, shape index: {}]   ;;  %s1826_s8 = inlined_call_operand.vmem [shape: f32[2,8,32], index: 8, kind: output, shape index: {}]  }
   0x1   :  { %s1619_s29 = smov 0  }
   0x2 LB: > { %s30_s30 = sadd.s32 1, %s1555_s28  ;;  %p1333_p0 = scmp.ge.s32.totalorder %s1559_s29, 1  ;;  %s1559_s29 = sphi %s1619_s29, %s18_s29   ;;  %s1555_s28 = sphi %s1617_s28, %s1830_s28   ;;  %s1551_s27 = sphi %s1615_s27, %s1829_s27  }
   0x3   : > { %p32_p1 = scmp.ge.s32.totalorder %s30_s30, 2  ;;  %p303_p2 = scmp.lt.s32.totalorder %s1559_s29, 3 }
   0x5   : > { %s1832_s30 = smov (%p32_p1, %s30_s30), 0  ;;  %p304_p3 = pnand %p1333_p0, %p303_p2 }
   0x6   : > { %p352_p4 = scmp.lt.s32.totalorder (!%p304_p3), %s1551_s27, 1  ;;  %vm400_vm0 = vcmask (!%p304_p3), 261120   ;;  %v1513_v7 = vld [vmem:[%s1824_s6] sm:$0xff] (!%p304_p3)   ;;  %v1561_v8 = vmov (!%p304_p3), 0.0   ;;  %v1514_v10 = vld [vmem:[%s1824_s6 + $0x8] sm:$0xff] (!%p304_p3)   ;;  %vm1562_vm1 = vmmov (!%p304_p3), 0  }
   0x7   : > { %307 = sbr.rel (%p304_p3) target bundleno = 2926 (0xb6e), region = 52  ;;  %1392 = vmatprep.subr.bf16.mxu0 (!%p304_p3), %v1561_v8  ;;  %1400 = vmatprep.subr.bf16.mxu1 (!%p304_p3), %v1561_v8  ;;  %v1515_v12 = vld [vmem:[%s1823_s5] sm:$0xff] (!%p304_p3)   ;;  %v1516_v13 = vld [vmem:[%s1823_s5 + $0x8] sm:$0xff] (!%p304_p3)   ;;  %vm445_vm4 = vcmask (!%p304_p3), 60416   ;;  %s1563_s11 = smov (!%p304_p3), 120   ;;  %vm591_vm5 = vcmask (!%p304_p3), 64512  }
   0x8   : > { %1393 = vmatpush3.bf16.msra.mxu0 (!%p304_p3), %v1513_v7  ;;  %1396 = vmatprep.mubr.msk.bf16.mxu0 (!%p304_p3), %vm1562_vm1, %v1561_v8  ;;  %v1342_v22 = vld [vmem:[%s1821_s3] ss:$0 sm:$0xff] (!%p304_p3)  ;;  %s1565_s16 = smov (!%p304_p3), 112   ;;  %vm654_vm7 = vcmask (!%p304_p3), 1043456   ;;  %s1566_s17 = smov (!%p304_p3), 88  }
   0x9   : > { %1394 = vmatprep.subr.bf16.mxu0 (!%p304_p3), %v1561_v8  ;;  %1404 = vmatprep.mubr.msk.bf16.mxu1 (!%p304_p3), %vm1562_vm1, %v1561_v8  ;;  %v1343_v25 = vld [vmem:[%s1822_s4] ss:$0 sm:$0xff] (!%p304_p3)  ;;  %s1567_s22 = smov (!%p304_p3), 80   ;;  %s1568_s23 = smov (!%p304_p3), 104  }
   0xa   : > { %1401 = vmatpush3.bf16.msra.mxu1 (!%p304_p3), %v1515_v12  ;;  %s1569_s26 = smov (!%p304_p3), 72  }
   0xb   : > { %1402 = vmatprep.subr.bf16.mxu1 (!%p304_p3), %v1561_v8 }
   0xc   : > { %1395 = vmatpush3.bf16.msra.mxu0 (!%p304_p3), %v1514_v10 }
   0xd   : > { %1408 = vmatprep.subr.bf16.mxu0 (!%p304_p3), %v1561_v8 }
   0xe   : > { %s1834_s27 = smov (!%p352_p4, %s1551_s27), 1  ;;  %1403 = vmatpush3.bf16.msra.mxu1 %v1516_v13 }
   0xf   : > { %s1636_s9 = sshll.u32 %s1834_s27, 3  ;;  %1414 = vmatprep.subr.bf16.mxu1 %v1561_v8 }
  0x10   : > { %s358_s12 = scalar_lea.vmem %s1818_s0, %s1636_s9  ;;  %s362_s15 = scalar_lea.vmem %s1819_s1, %s1636_s9 }
  0x11   : > { %v1642_v0 = vld [vmem:[%s358_s12] sm:$0xff]  ;;  %s1336_s12 = sshll.u32 %s1834_s27, 1  ;;  %s1564_s27 = smov 96  }
  0x12   : > { %v488_v1 = vsel %vm400_vm0, %v1642_v0, 0.0  ;;  %v382_v9 = vld [vmem:[%s362_s15] sm:$0xff]  ;;  %s369_s15 = scalar_lea.vmem %s1820_s2, %s1336_s12  ;;  %s376_s14 = scalar_lea.vmem %s1826_s8, %s1636_s9 }
  0x13   : > { %489 = vadd.xlane.f32.xlu0 %v488_v1  ;;  %v383_v11 = vpack.c.bf16 %v382_v9, %v382_v9  ;;  %v586_v46 = vld [vmem:[%s369_s15] sm:$0x3] }
  0x14   : > { %v587_v47 = vunpack.c.0.s8 %v586_v46 }
  0x15   : > { %1397 = vmatmul.mubr.msk.bf16.vlgmr.msra.gmra.mrb[0].mxu0 %vm400_vm0, %v383_v11 }
  0x16   : > { %1410 = vmatprep.mubr.msk.bf16.mxu0 %vm1562_vm1, %v1561_v8  ;;  %vm1710_vm6 = vcmp.eq.s32.totalorder %v587_v47, 0 }
  0xa0   : > { %v490_v2 = vpop.xlane.xlu0 %489 }
  0xa1   : > { %v492_v3 = vmul.f32 0.03125, %v490_v2 }
  0xa3   : > { %v493_v4 = vsub.f32 %v1642_v0, %v492_v3 }
  0xa5   : > { %v494_v5 = vmul.f32 %v493_v4, %v493_v4  ;;  %v506_v23 = vmul.f32 %v1342_v22, %v493_v4 }
  0xa7   : > { %v495_v6 = vsel %vm400_vm0, %v494_v5, 0.0 }
  0xa8   : > { %496 = vadd.xlane.f32.xlu0 %v495_v6 }
  0xe8   : > { %v438_v29 = vpop.f32.mrb[0].mxu0 }
  0xe9   : > { %v1686_v30 = vpack.c.bf16 %v438_v29, %v438_v29  ;;  %v1398_v31 = vpop.f32.mrb[1].mxu0 }
  0xea   : > { %v441_v32 = vpop.f32.mrb[2].mxu0 }
  0xeb   : > { %446 = vst.msk [vmem:[#allocation2] sm:$0xf] %vm445_vm4, %v1686_v30  ;;  %v1399_v33 = vpop.f32.mrb[3].mxu0  ;;  %454 = vrot.lane.b32.xlu1 %v1686_v30, %s1563_s11 }
  0xf2   : > { %v589_v34 = vld [vmem:[#allocation2] sm:$0xf] }
  0xf3   : > { %v596_v35 = vsel %vm591_vm5, %v589_v34, 0 }
  0xf4   : > { %1409 = vmatpush3.bf16.xpose.msra.mxu0 %v596_v35 }
  0xf5   : > { %1420 = vmatprep.subr.bf16.mxu0 %v1561_v8 }
 0x135   : > { %v497_v14 = vpop.xlane.xlu0 %496 }
 0x136   : > { %v499_v15 = vmul.f32 0.032258064, %v497_v14 }
 0x138   : > { %1517 = vrsqrt.f32 %v499_v15  ;;  %vm509_vm2 = vcmp.eq.f32.partialorder %v499_v15, inf  ;;  %v512_v18 = vand.u32 2147483648, %v499_v15  ;;  %vm511_vm3 = vcmp.eq.f32.partialorder %v499_v15, 0.0 }
 0x142   : > { %v1518_v16 = vpop.eup %1517 }
 0x143   : > { %v508_v17 = vmul.f32 %v1518_v16, %v499_v15 }
 0x145   : > { %v510_v19 = vsel %vm509_vm2, %v499_v15, %v508_v17  ;;  %v813_v17 = vld [vmem:[%s1825_s7 + $0x4] sm:$0xf] }
 0x146   : > { %v513_v20 = vsel %vm511_vm3, %v512_v18, %v510_v19  ;;  %v818_v18 = vsel %vm654_vm7, %v813_v17, 0 }
 0x147   : > { %v514_v21 = vadd.f32 1e-06, %v513_v20 }
 0x149   : > { %1519 = vrcp.f32 %v514_v21 }
 0x153   : > { %v1520_v24 = vpop.eup %1519 }
 0x154   : > { %v516_v26 = vmul.f32 %v1520_v24, %v506_v23  ;;  %v699_v24 = vld [vmem:[%s1825_s7] sm:$0xf] }
 0x156   : > { %v523_v27 = vadd.f32 %v1343_v25, %v516_v26 }
 0x158   : > { %v524_v28 = vpack.c.bf16 %v523_v27, %v523_v27  ;;  %v864_v27 = vsel %vm654_vm7, %v699_v24, 0 }
 0x15a   : > { %1405 = vmatmul.mubr.msk.bf16.vlgmr.msra.gmra.mrb[0].mxu1 %vm400_vm0, %v524_v28 }
 0x15b   : > { %1416 = vmatprep.mubr.msk.bf16.mxu1 %vm1562_vm1, %v1561_v8 }
 0x15d   : > { %v455_v36 = vpop.permute.xlu1 %454 }
 0x15e   : > { %458 = vst.msk [vmem:[#allocation2 + $0x4] sm:$0xf] %vm445_vm4, %v455_v36 }
 0x165   : > { %v701_v38 = vld [vmem:[#allocation2 + $0x4] sm:$0xf] }
 0x166   : > { %v711_v44 = vsel %vm591_vm5, %v701_v38, 0 }
 0x22d   : > { %v578_v37 = vpop.f32.mrb[0].mxu1 }
 0x22e   : > { %v584_v39 = vmul.f32 0.35355338, %v578_v37  ;;  %v1406_v40 = vpop.f32.mrb[1].mxu1 }
 0x22f   : > { %v581_v41 = vpop.f32.mrb[2].mxu1 }
 0x230   : > { %v1694_v42 = vpack.c.bf16 %v584_v39, %v584_v39  ;;  %v1407_v43 = vpop.f32.mrb[3].mxu1 }
 0x232   : > { %705 = vrot.lane.b32.xlu1 %v1694_v42, %s1563_s11  ;;  %1411 = vmatmul.mubr.msk.bf16.vlgmr.msra.gmra.mrb[4].mxu0 %vm591_vm5, %v1694_v42 }
 0x233   : > { %1421 = vmatpush3.bf16.xpose.msra.mxu0 %v711_v44  ;;  %1422 = vmatprep.mubr.msk.bf16.mxu0 %vm1562_vm1, %v1561_v8 }
 0x234   : > { %1432 = vmatprep.subr.bf16.mxu0 %v1561_v8 }
 0x2a4   : > { %v706_v45 = vpop.permute.xlu1 %705 }
 0x2a5   : > { %1423 = vmatmul.mubr.msk.bf16.vlgmr.msra.gmra.mrb[8].mxu0 %vm591_vm5, %v706_v45 }
 0x2a6   : > { %1434 = vmatprep.mubr.msk.bf16.mxu0 %vm1562_vm1, %v1561_v8  ;;  %1433 = vmatpush3.bf16.msra.mxu0 %v818_v18 }
 0x2a7   : > { %1444 = vmatprep.subr.bf16.mxu0 %v1561_v8 }
 0x305   : > { %v632_v49 = vpop.f32.mrb[4].mxu0 }
 0x306   : > { %v638_v50 = vsel %vm1710_vm6, -1e+09, %v632_v49  ;;  %v1412_v51 = vpop.f32.mrb[5].mxu0 }
 0x307   : > { %v635_v52 = vpop.f32.mrb[6].mxu0  ;;  %v639_v53 = vsel %vm591_vm5, %v638_v50, -inf }
 0x308   : > { %640 = vmax.xlane.f32.xlu0 %v639_v53  ;;  %v1413_v54 = vpop.f32.mrb[7].mxu0 }
 0x31e   : > { %450 = vrot.lane.b32.xlu0 %v1686_v30, %s1564_s27 }
 0x378   : > { %v747_v55 = vpop.f32.mrb[8].mxu0 }
 0x379   : > { %v753_v56 = vsel %vm1710_vm6, -1e+09, %v747_v55  ;;  %v1424_v57 = vpop.f32.mrb[9].mxu0 }
 0x37a   : > { %v750_v58 = vpop.f32.mrb[10].mxu0  ;;  %v754_v59 = vsel %vm591_vm5, %v753_v56, -inf }
 0x37b   : > { %755 = vmax.xlane.f32.xlu1 %v754_v59  ;;  %v1425_v60 = vpop.f32.mrb[11].mxu0 }
 0x38c   : > { %464 = vrot.lane.b32.xlu1 %v1686_v30, %s1565_s16 }
 0x395   : > { %v641_v61 = vpop.xlane.xlu0 %640 }
 0x396   : > { %v642_v62 = vsub.f32 %v638_v50, %v641_v61 }
 0x398   : > { %v643_v63 = vmul.f32 1.442695, %v642_v62 }
 0x399   : > { %v451_v1 = vpop.permute.xlu0 %450 }
 0x39a   : > { %1521 = vpow2.f32 %v643_v63  ;;  %453 = vst.msk [vmem:[#allocation3] sm:$0xf] %vm445_vm4, %v451_v1 }
 0x3a1   : > { %v590_v2 = vld [vmem:[#allocation3] sm:$0xf] }
 0x3a2   : > { %v656_v3 = vsel %vm654_vm7, %v590_v2, 0 }
 0x3a3   : > { %1415 = vmatpush3.bf16.msra.mxu1 %v656_v3 }
 0x3a4   : > { %v1522_v4 = vpop.eup %1521  ;;  %1426 = vmatprep.subr.bf16.mxu1 %v1561_v8 }
 0x3a5   : > { %v645_v5 = vsel %vm591_vm5, %v1522_v4, 0.0 }
 0x3a6   : > { %646 = vadd.xlane.f32.xlu0 %v645_v5 }
 0x408   : > { %v756_v6 = vpop.xlane.xlu1 %755 }
 0x409   : > { %v757_v7 = vsub.f32 %v753_v56, %v756_v6 }
 0x40b   : > { %v758_v9 = vmul.f32 1.442695, %v757_v7 }
 0x40c   : > { %v465_v10 = vpop.permute.xlu1 %464 }
 0x40d   : > { %1523 = vpow2.f32 %v758_v9  ;;  %468 = vst.msk [vmem:[#allocation2 + $0x8] sm:$0xf] %vm445_vm4, %v465_v10 }
 0x414   : > { %v907_v35 = vld [vmem:[#allocation2 + $0x8] sm:$0xf] }
 0x415   : > { %v916_v40 = vsel %vm591_vm5, %v907_v35, 0 }
 0x417   : > { %v1524_v11 = vpop.eup %1523 }
 0x418   : > { %v760_v12 = vsel %vm591_vm5, %v1524_v11, 0.0 }
 0x419   : > { %761 = vadd.xlane.f32.xlu0 %v760_v12  ;;  %v1018_v12 = vld [vmem:[%s1825_s7 + $0x8] sm:$0xf] }
 0x42f   : > { %459 = vrot.lane.b32.xlu0 %v1686_v30, %s1566_s17 }
 0x433   : > { %v647_v13 = vpop.xlane.xlu0 %646  ;;  %910 = vrot.lane.b32.xlu0 %v1694_v42, %s1565_s16 }
 0x434   : > { %1525 = vrcp.f32 %v647_v13  ;;  %v1023_v13 = vsel %vm654_vm7, %v1018_v12, 0 }
 0x43e   : > { %v1526_v14 = vpop.eup %1525 }
 0x43f   : > { %v649_v15 = vmul.f32 %v1526_v14, %v1522_v4 }
 0x441   : > { %v650_v16 = vpack.c.bf16 %v649_v15, %v649_v15 }
 0x443   : > { %1417 = vmatmul.mubr.msk.bf16.vlgmr.msra.gmra.mrb[4].mxu1 %vm591_vm5, %v650_v16 }
 0x444   : > { %1428 = vmatprep.mubr.msk.bf16.mxu1 %vm1562_vm1, %v1561_v8 }
 0x4a6   : > { %v762_v19 = vpop.xlane.xlu0 %761 }
 0x4a7   : > { %1527 = vrcp.f32 %v762_v19 }
 0x4aa   : > { %v460_v20 = vpop.permute.xlu0 %459 }
 0x4ab   : > { %463 = vst.msk [vmem:[#allocation3 + $0x4] sm:$0xf] %vm445_vm4, %v460_v20 }
 0x4ae   : > { %v911_v41 = vpop.permute.xlu0 %910 }
 0x4b1   : > { %v1528_v21 = vpop.eup %1527 }
 0x4b2   : > { %v764_v22 = vmul.f32 %v1528_v21, %v1524_v11  ;;  %v703_v23 = vld [vmem:[#allocation3 + $0x4] sm:$0xf] }
 0x4b3   : > { %v770_v25 = vsel %vm654_vm7, %v703_v23, 0 }
 0x4b4   : > { %1427 = vmatpush3.bf16.msra.mxu1 %v770_v25  ;;  %v765_v26 = vpack.c.bf16 %v764_v22, %v764_v22 }
 0x4b5   : > { %1438 = vmatprep.subr.bf16.mxu1 %v1561_v8 }
 0x4b7   : > { %1429 = vmatmul.mubr.msk.bf16.vlgmr.msra.gmra.mrb[8].mxu1 %vm591_vm5, %v765_v26 }
 0x4b8   : > { %1439 = vmatpush3.bf16.msra.mxu1 %v864_v27  ;;  %1440 = vmatprep.mubr.msk.bf16.mxu1 %vm1562_vm1, %v1561_v8 }
 0x4b9   : > { %1450 = vmatprep.subr.bf16.mxu1 %v1561_v8 }
 0x516   : > { %v692_v28 = vpop.f32.mrb[4].mxu1 }
 0x517   : > { %v698_v29 = vpack.c.bf16 %v692_v28, %v692_v28  ;;  %v1418_v31 = vpop.f32.mrb[5].mxu1 }
 0x518   : > { %v695_v32 = vpop.f32.mrb[6].mxu1 }
 0x519   : > { %v1419_v33 = vpop.f32.mrb[7].mxu1  ;;  %1441 = vmatmul.mubr.msk.bf16.vlgmr.msra.gmra.mrb[12].mxu1 %vm591_vm5, %v698_v29 }
 0x51a   : > { %1452 = vmatprep.mubr.msk.bf16.mxu1 %vm1562_vm1, %v1561_v8 }
 0x58a   : > { %v806_v34 = vpop.f32.mrb[8].mxu1 }
 0x58b   : > { %v812_v36 = vpack.c.bf16 %v806_v34, %v806_v34  ;;  %v1430_v37 = vpop.f32.mrb[9].mxu1 }
 0x58c   : > { %v809_v38 = vpop.f32.mrb[10].mxu1 }
 0x58d   : > { %v1431_v39 = vpop.f32.mrb[11].mxu1  ;;  %1435 = vmatmul.mubr.msk.bf16.vlgmr.msra.gmra.mrb[12].mxu0 %vm591_vm5, %v812_v36 }
 0x58e   : > { %1445 = vmatpush3.bf16.xpose.msra.mxu0 %v916_v40  ;;  %1446 = vmatprep.mubr.msk.bf16.mxu0 %vm1562_vm1, %v1561_v8  ;;  %v1178_v40 = vld [vmem:[%s1825_s7 + $0xc] sm:$0xf] }
 0x58f   : > { %1456 = vmatprep.subr.bf16.mxu0 %v1561_v8 }
 0x595   : > { %1447 = vmatmul.mubr.msk.bf16.vlgmr.msra.gmra.mrb[16].mxu0 %vm591_vm5, %v911_v41  ;;  %v1183_v41 = vsel %vm654_vm7, %v1178_v40, 0 }
 0x596   : > { %1458 = vmatprep.mubr.msk.bf16.mxu0 %vm1562_vm1, %v1561_v8  ;;  %1457 = vmatpush3.bf16.msra.mxu0 %v1023_v13 }
 0x597   : > { %1468 = vmatprep.subr.bf16.mxu0 %v1561_v8 }
 0x5ec   : > { %v900_v43 = vpop.f32.mrb[12].mxu1 }
 0x5ed   : > { %v1442_v44 = vpop.f32.mrb[13].mxu1 }
 0x5ee   : > { %v903_v45 = vpop.f32.mrb[14].mxu1 }
 0x5ef   : > { %v1443_v46 = vpop.f32.mrb[15].mxu1 }
 0x660   : > { %v854_v47 = vpop.f32.mrb[12].mxu0 }
 0x661   : > { %v1760_v49 = vadd.f32 %v900_v43, %v854_v47  ;;  %v1436_v50 = vpop.f32.mrb[13].mxu0 }
 0x662   : > { %v857_v51 = vpop.f32.mrb[14].mxu0 }
 0x663   : > { %v1437_v52 = vpop.f32.mrb[15].mxu0 }
 0x668   : > { %v952_v53 = vpop.f32.mrb[16].mxu0 }
 0x669   : > { %v958_v54 = vsel %vm1710_vm6, -1e+09, %v952_v53  ;;  %v1448_v55 = vpop.f32.mrb[17].mxu0 }
 0x66a   : > { %v955_v56 = vpop.f32.mrb[18].mxu0  ;;  %v959_v57 = vsel %vm591_vm5, %v958_v54, -inf }
 0x66b   : > { %960 = vmax.xlane.f32.xlu0 %v959_v57  ;;  %v1449_v58 = vpop.f32.mrb[19].mxu0 }
 0x681   : > { %469 = vrot.lane.b32.xlu0 %v1686_v30, %s1567_s22 }
 0x685   : > { %1070 = vrot.lane.b32.xlu0 %v1694_v42, %s1568_s23 }
 0x6f8   : > { %v961_v59 = vpop.xlane.xlu0 %960 }
 0x6f9   : > { %v962_v60 = vsub.f32 %v958_v54, %v961_v59 }
 0x6fb   : > { %v963_v61 = vmul.f32 1.442695, %v962_v60 }
 0x6fc   : > { %v470_v62 = vpop.permute.xlu0 %469 }
 0x6fd   : > { %1529 = vpow2.f32 %v963_v61  ;;  %473 = vst.msk [vmem:[#allocation3 + $0x8] sm:$0xf] %vm445_vm4, %v470_v62 }
 0x700   : > { %v1071_v11 = vpop.permute.xlu0 %1070 }
 0x704   : > { %v909_v63 = vld [vmem:[#allocation3 + $0x8] sm:$0xf] }
 0x705   : > { %v975_v1 = vsel %vm654_vm7, %v909_v63, 0 }
 0x706   : > { %1451 = vmatpush3.bf16.msra.mxu1 %v975_v1 }
 0x707   : > { %v1530_v2 = vpop.eup %1529  ;;  %1462 = vmatprep.subr.bf16.mxu1 %v1561_v8 }
 0x708   : > { %v965_v3 = vsel %vm591_vm5, %v1530_v2, 0.0 }
 0x709   : > { %966 = vadd.xlane.f32.xlu1 %v965_v3 }
 0x71a   : > { %474 = vrot.lane.b32.xlu1 %v1686_v30, %s1568_s23 }
 0x796   : > { %v967_v42 = vpop.xlane.xlu1 %966 }
 0x797   : > { %1531 = vrcp.f32 %v967_v42 }
 0x79a   : > { %v475_v4 = vpop.permute.xlu1 %474 }
 0x79b   : > { %478 = vst.msk [vmem:[#allocation2 + $0xc] sm:$0xf] %vm445_vm4, %v475_v4 }
 0x7a1   : > { %v1532_v5 = vpop.eup %1531 }
 0x7a2   : > { %v969_v6 = vmul.f32 %v1532_v5, %v1530_v2  ;;  %v1067_v7 = vld [vmem:[#allocation2 + $0xc] sm:$0xf] }
 0x7a3   : > { %v1076_v10 = vsel %vm591_vm5, %v1067_v7, 0 }
 0x7a4   : > { %v970_v9 = vpack.c.bf16 %v969_v6, %v969_v6 }
 0x7a6   : > { %1453 = vmatmul.mubr.msk.bf16.vlgmr.msra.gmra.mrb[16].mxu1 %vm591_vm5, %v970_v9 }
 0x7a7   : > { %1463 = vmatpush3.bf16.xpose.msra.mxu1 %v1076_v10  ;;  %1464 = vmatprep.mubr.msk.bf16.mxu1 %vm1562_vm1, %v1561_v8 }
 0x7a8   : > { %1474 = vmatprep.subr.bf16.mxu1 %v1561_v8 }
 0x7ae   : > { %1465 = vmatmul.mubr.msk.bf16.vlgmr.msra.gmra.mrb[20].mxu1 %vm591_vm5, %v1071_v11 }
 0x7af   : > { %1476 = vmatprep.mubr.msk.bf16.mxu1 %vm1562_vm1, %v1561_v8  ;;  %1475 = vmatpush3.bf16.msra.mxu1 %v1183_v41 }
 0x879   : > { %v1011_v14 = vpop.f32.mrb[16].mxu1 }
 0x87a   : > { %v1017_v15 = vpack.c.bf16 %v1011_v14, %v1011_v14  ;;  %v1454_v16 = vpop.f32.mrb[17].mxu1 }
 0x87b   : > { %v1014_v17 = vpop.f32.mrb[18].mxu1 }
 0x87c   : > { %v1455_v18 = vpop.f32.mrb[19].mxu1  ;;  %1459 = vmatmul.mubr.msk.bf16.vlgmr.msra.gmra.mrb[20].mxu0 %vm591_vm5, %v1017_v15 }
 0x87d   : > { %1470 = vmatprep.mubr.msk.bf16.mxu0 %vm1562_vm1, %v1561_v8 }
 0x881   : > { %v1112_v19 = vpop.f32.mrb[20].mxu1 }
 0x882   : > { %v1118_v20 = vsel %vm1710_vm6, -1e+09, %v1112_v19  ;;  %v1466_v21 = vpop.f32.mrb[21].mxu1 }
 0x883   : > { %v1115_v22 = vpop.f32.mrb[22].mxu1  ;;  %v1119_v23 = vsel %vm591_vm5, %v1118_v20, -inf }
 0x884   : > { %1120 = vmax.xlane.f32.xlu0 %v1119_v23  ;;  %v1467_v24 = vpop.f32.mrb[23].mxu1 }
 0x89a   : > { %479 = vrot.lane.b32.xlu0 %v1686_v30, %s1569_s26 }
 0x911   : > { %v1121_v25 = vpop.xlane.xlu0 %1120 }
 0x912   : > { %v1122_v26 = vsub.f32 %v1118_v20, %v1121_v25 }
 0x914   : > { %v1123_v27 = vmul.f32 1.442695, %v1122_v26 }
 0x915   : > { %v480_v28 = vpop.permute.xlu0 %479 }
 0x916   : > { %1533 = vpow2.f32 %v1123_v27  ;;  %483 = vst.msk [vmem:[#allocation3 + $0xc] sm:$0xf] %vm445_vm4, %v480_v28 }
 0x91d   : > { %v1069_v8 = vld [vmem:[#allocation3 + $0xc] sm:$0xf] }
 0x91e   : > { %v1135_v48 = vsel %vm654_vm7, %v1069_v8, 0 }
 0x91f   : > { %1469 = vmatpush3.bf16.msra.mxu0 %v1135_v48 }
 0x920   : > { %v1534_v29 = vpop.eup %1533 }
 0x921   : > { %v1125_v31 = vsel %vm591_vm5, %v1534_v29, 0.0 }
 0x922   : > { %1126 = vadd.xlane.f32.xlu1 %v1125_v31 }
 0x94f   : > { %v1059_v32 = vpop.f32.mrb[20].mxu0 }
 0x950   : > { %v1065_v33 = vadd.f32 %v1059_v32, %v1760_v49  ;;  %v1460_v34 = vpop.f32.mrb[21].mxu0 }
 0x951   : > { %v1062_v30 = vpop.f32.mrb[22].mxu0 }
 0x952   : > { %v1461_v35 = vpop.f32.mrb[23].mxu0 }
 0x9af   : > { %v1127_v36 = vpop.xlane.xlu1 %1126 }
 0x9b0   : > { %1535 = vrcp.f32 %v1127_v36 }
 0x9ba   : > { %v1536_v37 = vpop.eup %1535 }
 0x9bb   : > { %v1129_v38 = vmul.f32 %v1536_v37, %v1534_v29 }
 0x9bd   : > { %v1130_v39 = vpack.c.bf16 %v1129_v38, %v1129_v38 }
 0x9bf   : > { %1471 = vmatmul.mubr.msk.bf16.vlgmr.msra.gmra.mrb[24].mxu0 %vm591_vm5, %v1130_v39 }
 0xa92   : > { %v1171_v43 = vpop.f32.mrb[24].mxu0 }
 0xa93   : > { %v1177_v44 = vpack.c.bf16 %v1171_v43, %v1171_v43  ;;  %v1472_v45 = vpop.f32.mrb[25].mxu0 }
 0xa94   : > { %v1174_v46 = vpop.f32.mrb[26].mxu0 }
 0xa95   : > { %v1473_v47 = vpop.f32.mrb[27].mxu0  ;;  %1477 = vmatmul.mubr.msk.bf16.vlgmr.msra.gmra.mrb[24].mxu1 %vm591_vm5, %v1177_v44 }
 0xb68   : > { %v1219_v49 = vpop.f32.mrb[24].mxu1 }
 0xb69   : > { %v1225_v50 = vadd.f32 %v1219_v49, %v1065_v33  ;;  %v1478_v51 = vpop.f32.mrb[25].mxu1 }
 0xb6a   : > { %v1222_v52 = vpop.f32.mrb[26].mxu1 }
 0xb6b   : > { %v1226_v53 = vadd.f32 %v1225_v50, %v1642_v0  ;;  %v1479_v54 = vpop.f32.mrb[27].mxu1 }
 0xb6d   : > { %1227 = vst.msk [vmem:[%s376_s14] sm:$0xff] %vm400_vm0, %v1226_v53 }
 0xb6e PF: > { %s18_s29 = sadd.s32 1, %s1559_s29   ;;  %s1829_s27 = smov %s1555_s28 }
 0xb6f   : > { %p15_p5 = scmp.ge.s32.totalorder %s18_s29, 4   ;;  %s1830_s28 = smov %s1832_s30 }
 0xb71   :  { %17 = sbr.rel (!%p15_p5) target bundleno = 2 (0x2), region = 104 }

// kernel: decoder_block.3
= control target key start
LH: loop header
LB: loop body
LE: loop exit
PB: predicated region body
PF: predicated region fallthrough
CT: control target
= control target key end

     0   :  { %s1551_s24 = smov 0   ;;  %s1553_s25 = smov 0   ;;  %s1750_s0 = inlined_call_operand.vmem [shape: f32[2,8,32], index: 0, kind: input, shape index: {}]   ;;  %s1751_s1 = inlined_call_operand.vmem [shape: s8[2,8,8], index: 1, kind: input, shape index: {}]   ;;  %s1752_s2 = inlined_call_operand.vmem [shape: f32[1,32], index: 2, kind: input, shape index: {}]   ;;  %s1753_s3 = inlined_call_operand.vmem [shape: f32[1,32], index: 3, kind: input, shape index: {}]   ;;  %s1754_s4 = inlined_call_operand.vmem [shape: bf16[32,32], index: 4, kind: input, shape index: {}]   ;;  %s1755_s5 = inlined_call_operand.vmem [shape: bf16[32,64], index: 5, kind: input, shape index: {}]   ;;  %s1756_s6 = inlined_call_operand.vmem [shape: bf16[32,32], index: 6, kind: input, shape index: {}]   ;;  %s1757_s7 = inlined_call_operand.vmem [shape: f32[2,8,32], index: 7, kind: output, shape index: {}]  }
   0x1   :  { %s1555_s26 = smov 0  }
   0x2 LB: > { %s29_s27 = sadd.s32 1, %s1496_s25  ;;  %p1275_p0 = scmp.ge.s32.totalorder %s1500_s26, 1  ;;  %s1500_s26 = sphi %s1555_s26, %s17_s26   ;;  %s1496_s25 = sphi %s1553_s25, %s1761_s25   ;;  %s1492_s24 = sphi %s1551_s24, %s1760_s24  }
   0x3   : > { %p31_p1 = scmp.ge.s32.totalorder %s29_s27, 2  ;;  %p264_p2 = scmp.lt.s32.totalorder %s1500_s26, 3 }
   0x5   : > { %s1763_s27 = smov (%p31_p1, %s29_s27), 0  ;;  %p265_p3 = pnand %p1275_p0, %p264_p2 }
   0x6   : > { %p304_p4 = scmp.lt.s32.totalorder (!%p265_p3), %s1492_s24, 1  ;;  %vm330_vm0 = vcmask (!%p265_p3), 261120   ;;  %v1454_v7 = vld [vmem:[%s1755_s5] sm:$0xff] (!%p265_p3)   ;;  %v1502_v8 = vmov (!%p265_p3), 0.0   ;;  %vm1503_vm1 = vmmov (!%p265_p3), 0   ;;  %v1455_v9 = vld [vmem:[%s1755_s5 + $0x8] sm:$0xff] (!%p265_p3)  }
   0x7   : > { %268 = sbr.rel (%p265_p3) target bundleno = 2940 (0xb7c), region = 48  ;;  %1333 = vmatprep.subr.bf16.mxu0 (!%p265_p3), %v1502_v8  ;;  %1337 = vmatprep.mubr.msk.bf16.mxu0 (!%p265_p3), %vm1503_vm1, %v1502_v8  ;;  %v1456_v10 = vld [vmem:[%s1754_s4] sm:$0xff] (!%p265_p3)   ;;  %v1457_v11 = vld [vmem:[%s1754_s4 + $0x8] sm:$0xff] (!%p265_p3)   ;;  %vm368_vm4 = vcmask (!%p265_p3), 257024   ;;  %vm430_vm5 = vcmask (!%p265_p3), 60416   ;;  %s1504_s21 = smov (!%p265_p3), 120  }
   0x8   : > { %1334 = vmatpush3.bf16.msra.mxu0 (!%p265_p3), %v1454_v7  ;;  %1341 = vmatprep.subr.bf16.mxu1 (!%p265_p3), %v1502_v8  ;;  %v1279_v20 = vld [vmem:[%s1752_s2] ss:$0 sm:$0xff] (!%p265_p3)  ;;  %vm544_vm6 = vcmask (!%p265_p3), 64512   ;;  %s1506_s9 = smov (!%p265_p3), 112   ;;  %vm607_vm8 = vcmask (!%p265_p3), 1043456   ;;  %s1507_s10 = smov (!%p265_p3), 88  }
   0x9   : > { %1335 = vmatprep.subr.bf16.mxu0 (!%p265_p3), %v1502_v8  ;;  %1345 = vmatprep.mubr.msk.bf16.mxu1 (!%p265_p3), %vm1503_vm1, %v1502_v8  ;;  %v1280_v23 = vld [vmem:[%s1753_s3] ss:$0 sm:$0xff] (!%p265_p3)  ;;  %s1508_s15 = smov (!%p265_p3), 80   ;;  %s1509_s16 = smov (!%p265_p3), 104  }
   0xa   : > { %1342 = vmatpush3.bf16.msra.mxu1 (!%p265_p3), %v1456_v10  ;;  %s1510_s19 = smov (!%p265_p3), 72  }
   0xb   : > { %1343 = vmatprep.subr.bf16.mxu1 (!%p265_p3), %v1502_v8 }
   0xc   : > { %1336 = vmatpush3.bf16.msra.mxu0 (!%p265_p3), %v1455_v9 }
   0xd   : > { %1349 = vmatprep.subr.bf16.mxu0 (!%p265_p3), %v1502_v8 }
   0xe   : > { %s1765_s24 = smov (!%p304_p4, %s1492_s24), 1  ;;  %1344 = vmatpush3.bf16.msra.mxu1 %v1457_v11 }
   0xf   : > { %s1276_s28 = sshll.u32 %s1765_s24, 3  ;;  %1355 = vmatprep.subr.bf16.mxu1 %v1502_v8  ;;  %s1277_s22 = sshll.u32 %s1765_s24, 1 }
  0x10   : > { %s307_s8 = scalar_lea.vmem %s1750_s0, %s1276_s28  ;;  %s314_s30 = scalar_lea.vmem %s1751_s1, %s1277_s22 }
  0x11   : > { %v1577_v0 = vld [vmem:[%s307_s8] sm:$0xff]  ;;  %s1505_s8 = smov 96   ;;  %s321_s29 = scalar_lea.vmem %s1757_s7, %s1276_s28 }
  0x12   : > { %v331_v1 = vsel %vm330_vm0, %v1577_v0, 0.0  ;;  %v539_v45 = vld [vmem:[%s314_s30] sm:$0x3] }
  0x13   : > { %332 = vadd.xlane.f32.xlu0 %v331_v1  ;;  %v540_v46 = vunpack.c.0.s8 %v539_v45 }
  0x15   : > { %vm1641_vm7 = vcmp.eq.s32.totalorder %v540_v46, 0 }
  0xa0   : > { %v333_v2 = vpop.xlane.xlu0 %332 }
  0xa1   : > { %v335_v3 = vmul.f32 0.03125, %v333_v2 }
  0xa3   : > { %v336_v4 = vsub.f32 %v1577_v0, %v335_v3 }
  0xa5   : > { %v337_v5 = vmul.f32 %v336_v4, %v336_v4  ;;  %v349_v21 = vmul.f32 %v1279_v20, %v336_v4 }
  0xa7   : > { %v338_v6 = vsel %vm330_vm0, %v337_v5, 0.0 }
  0xa8   : > { %339 = vadd.xlane.f32.xlu0 %v338_v6 }
 0x135   : > { %v340_v12 = vpop.xlane.xlu0 %339 }
 0x136   : > { %v342_v13 = vmul.f32 0.032258064, %v340_v12 }
 0x138   : > { %1458 = vrsqrt.f32 %v342_v13  ;;  %vm352_vm2 = vcmp.eq.f32.partialorder %v342_v13, inf  ;;  %v355_v16 = vand.u32 2147483648, %v342_v13  ;;  %vm354_vm3 = vcmp.eq.f32.partialorder %v342_v13, 0.0 }
 0x142   : > { %v1459_v14 = vpop.eup %1458 }
 0x143   : > { %v351_v15 = vmul.f32 %v1459_v14, %v342_v13 }
 0x145   : > { %v353_v17 = vsel %vm352_vm2, %v342_v13, %v351_v15 }
 0x146   : > { %v356_v18 = vsel %vm354_vm3, %v355_v16, %v353_v17  ;;  %v766_v16 = vld [vmem:[%s1756_s6 + $0x4] sm:$0xf] }
 0x147   : > { %v357_v19 = vadd.f32 1e-06, %v356_v18  ;;  %v771_v17 = vsel %vm607_vm8, %v766_v16, 0 }
 0x149   : > { %1460 = vrcp.f32 %v357_v19 }
 0x153   : > { %v1461_v22 = vpop.eup %1460 }
 0x154   : > { %v359_v24 = vmul.f32 %v1461_v22, %v349_v21 }
 0x156   : > { %v366_v25 = vadd.f32 %v1280_v23, %v359_v24  ;;  %v652_v23 = vld [vmem:[%s1756_s6] sm:$0xf] }
 0x158   : > { %v367_v26 = vpack.c.bf16 %v366_v25, %v366_v25 }
 0x15a   : > { %369 = vst.msk [vmem:[#allocation2] sm:$0xf] %vm368_vm4, %v367_v26  ;;  %1338 = vmatmul.mubr.msk.bf16.vlgmr.msra.gmra.mrb[0].mxu0 %vm330_vm0, %v367_v26  ;;  %v817_v26 = vsel %vm607_vm8, %v652_v23, 0 }
 0x15b   : > { %1351 = vmatprep.mubr.msk.bf16.mxu0 %vm1503_vm1, %v1502_v8 }
 0x161   : > { %v476_v27 = vld [vmem:[#allocation2] sm:$0xf] }
 0x162   : > { %1346 = vmatmul.mubr.msk.bf16.vlgmr.msra.gmra.mrb[0].mxu1 %vm330_vm0, %v476_v27 }
 0x163   : > { %1357 = vmatprep.mubr.msk.bf16.mxu1 %vm1503_vm1, %v1502_v8 }
 0x22d   : > { %v423_v28 = vpop.f32.mrb[0].mxu0 }
 0x22e   : > { %v1617_v29 = vpack.c.bf16 %v423_v28, %v423_v28  ;;  %v1339_v30 = vpop.f32.mrb[1].mxu0 }
 0x22f   : > { %v426_v31 = vpop.f32.mrb[2].mxu0 }
 0x230   : > { %431 = vst.msk [vmem:[#allocation3] sm:$0xf] %vm430_vm5, %v1617_v29  ;;  %439 = vrot.lane.b32.xlu1 %v1617_v29, %s1504_s21  ;;  %v1340_v32 = vpop.f32.mrb[3].mxu0 }
 0x235   : > { %v531_v33 = vpop.f32.mrb[0].mxu1 }
 0x236   : > { %v537_v34 = vmul.f32 0.35355338, %v531_v33  ;;  %v1347_v35 = vpop.f32.mrb[1].mxu1 }
 0x237   : > { %v534_v36 = vpop.f32.mrb[2].mxu1  ;;  %v542_v37 = vld [vmem:[#allocation3] sm:$0xf] }
 0x238   : > { %v1622_v38 = vpack.c.bf16 %v537_v34, %v537_v34  ;;  %v1348_v39 = vpop.f32.mrb[3].mxu1  ;;  %v549_v40 = vsel %vm544_vm6, %v542_v37, 0 }
 0x239   : > { %1350 = vmatpush3.bf16.xpose.msra.mxu0 %v549_v40 }
 0x23a   : > { %658 = vrot.lane.b32.xlu1 %v1622_v38, %s1504_s21  ;;  %1361 = vmatprep.subr.bf16.mxu0 %v1502_v8 }
 0x240   : > { %1352 = vmatmul.mubr.msk.bf16.vlgmr.msra.gmra.mrb[4].mxu0 %vm544_vm6, %v1622_v38 }
 0x241   : > { %1363 = vmatprep.mubr.msk.bf16.mxu0 %vm1503_vm1, %v1502_v8 }
 0x2a2   : > { %v440_v41 = vpop.permute.xlu1 %439 }
 0x2a3   : > { %443 = vst.msk [vmem:[#allocation3 + $0x4] sm:$0xf] %vm430_vm5, %v440_v41 }
 0x2aa   : > { %v654_v42 = vld [vmem:[#allocation3 + $0x4] sm:$0xf] }
 0x2ab   : > { %v664_v43 = vsel %vm544_vm6, %v654_v42, 0 }
 0x2ac   : > { %1362 = vmatpush3.bf16.xpose.msra.mxu0 %v664_v43  ;;  %v659_v44 = vpop.permute.xlu1 %658 }
 0x2ad   : > { %1373 = vmatprep.subr.bf16.mxu0 %v1502_v8 }
 0x2b3   : > { %1364 = vmatmul.mubr.msk.bf16.vlgmr.msra.gmra.mrb[8].mxu0 %vm544_vm6, %v659_v44 }
 0x2b4   : > { %1375 = vmatprep.mubr.msk.bf16.mxu0 %vm1503_vm1, %v1502_v8  ;;  %1374 = vmatpush3.bf16.msra.mxu0 %v771_v17 }
 0x2b5   : > { %1385 = vmatprep.subr.bf16.mxu0 %v1502_v8 }
 0x313   : > { %v585_v48 = vpop.f32.mrb[4].mxu0 }
 0x314   : > { %v591_v49 = vsel %vm1641_vm7, -1e+09, %v585_v48  ;;  %v1353_v50 = vpop.f32.mrb[5].mxu0 }
 0x315   : > { %v588_v51 = vpop.f32.mrb[6].mxu0  ;;  %v592_v52 = vsel %vm544_vm6, %v591_v49, -inf }
 0x316   : > { %593 = vmax.xlane.f32.xlu0 %v592_v52  ;;  %v1354_v53 = vpop.f32.mrb[7].mxu0 }
 0x32c   : > { %435 = vrot.lane.b32.xlu0 %v1617_v29, %s1505_s8 }
 0x386   : > { %v700_v54 = vpop.f32.mrb[8].mxu0 }
 0x387   : > { %v706_v55 = vsel %vm1641_vm7, -1e+09, %v700_v54  ;;  %v1365_v56 = vpop.f32.mrb[9].mxu0 }
 0x388   : > { %v703_v57 = vpop.f32.mrb[10].mxu0  ;;  %v707_v58 = vsel %vm544_vm6, %v706_v55, -inf }
 0x389   : > { %708 = vmax.xlane.f32.xlu1 %v707_v58  ;;  %v1366_v59 = vpop.f32.mrb[11].mxu0 }
 0x39a   : > { %449 = vrot.lane.b32.xlu1 %v1617_v29, %s1506_s9 }
 0x3a3   : > { %v594_v60 = vpop.xlane.xlu0 %593 }
 0x3a4   : > { %v595_v61 = vsub.f32 %v591_v49, %v594_v60 }
 0x3a6   : > { %v596_v62 = vmul.f32 1.442695, %v595_v61 }
 0x3a7   : > { %v436_v63 = vpop.permute.xlu0 %435 }
 0x3a8   : > { %1462 = vpow2.f32 %v596_v62  ;;  %438 = vst.msk [vmem:[#allocation4] sm:$0xf] %vm430_vm5, %v436_v63 }
 0x3af   : > { %v543_v1 = vld [vmem:[#allocation4] sm:$0xf] }
 0x3b0   : > { %v609_v2 = vsel %vm607_vm8, %v543_v1, 0 }
 0x3b1   : > { %1356 = vmatpush3.bf16.msra.mxu1 %v609_v2 }
 0x3b2   : > { %v1463_v3 = vpop.eup %1462  ;;  %1367 = vmatprep.subr.bf16.mxu1 %v1502_v8 }
 0x3b3   : > { %v598_v4 = vsel %vm544_vm6, %v1463_v3, 0.0 }
 0x3b4   : > { %599 = vadd.xlane.f32.xlu0 %v598_v4 }
 0x416   : > { %v709_v5 = vpop.xlane.xlu1 %708 }
 0x417   : > { %v710_v6 = vsub.f32 %v706_v55, %v709_v5 }
 0x419   : > { %v711_v7 = vmul.f32 1.442695, %v710_v6 }
 0x41a   : > { %v450_v9 = vpop.permute.xlu1 %449 }
 0x41b   : > { %1464 = vpow2.f32 %v711_v7  ;;  %453 = vst.msk [vmem:[#allocation3 + $0x8] sm:$0xf] %vm430_vm5, %v450_v9 }
 0x422   : > { %v860_v34 = vld [vmem:[#allocation3 + $0x8] sm:$0xf] }
 0x423   : > { %v869_v40 = vsel %vm544_vm6, %v860_v34, 0 }
 0x425   : > { %v1465_v10 = vpop.eup %1464 }
 0x426   : > { %v713_v11 = vsel %vm544_vm6, %v1465_v10, 0.0 }
 0x427   : > { %714 = vadd.xlane.f32.xlu0 %v713_v11  ;;  %v971_v11 = vld [vmem:[%s1756_s6 + $0x8] sm:$0xf] }
 0x43d   : > { %444 = vrot.lane.b32.xlu0 %v1617_v29, %s1507_s10 }
 0x441   : > { %v600_v12 = vpop.xlane.xlu0 %599  ;;  %863 = vrot.lane.b32.xlu0 %v1622_v38, %s1506_s9 }
 0x442   : > { %1466 = vrcp.f32 %v600_v12  ;;  %v976_v12 = vsel %vm607_vm8, %v971_v11, 0 }
 0x44c   : > { %v1467_v13 = vpop.eup %1466 }
 0x44d   : > { %v602_v14 = vmul.f32 %v1467_v13, %v1463_v3 }
 0x44f   : > { %v603_v15 = vpack.c.bf16 %v602_v14, %v602_v14 }
 0x451   : > { %1358 = vmatmul.mubr.msk.bf16.vlgmr.msra.gmra.mrb[4].mxu1 %vm544_vm6, %v603_v15 }
 0x452   : > { %1369 = vmatprep.mubr.msk.bf16.mxu1 %vm1503_vm1, %v1502_v8 }
 0x4b4   : > { %v715_v18 = vpop.xlane.xlu0 %714 }
 0x4b5   : > { %1468 = vrcp.f32 %v715_v18 }
 0x4b8   : > { %v445_v19 = vpop.permute.xlu0 %444 }
 0x4b9   : > { %448 = vst.msk [vmem:[#allocation4 + $0x4] sm:$0xf] %vm430_vm5, %v445_v19 }
 0x4bc   : > { %v864_v41 = vpop.permute.xlu0 %863 }
 0x4bf   : > { %v1469_v20 = vpop.eup %1468 }
 0x4c0   : > { %v717_v21 = vmul.f32 %v1469_v20, %v1465_v10  ;;  %v656_v22 = vld [vmem:[#allocation4 + $0x4] sm:$0xf] }
 0x4c1   : > { %v723_v24 = vsel %vm607_vm8, %v656_v22, 0 }
 0x4c2   : > { %1368 = vmatpush3.bf16.msra.mxu1 %v723_v24  ;;  %v718_v25 = vpack.c.bf16 %v717_v21, %v717_v21 }
 0x4c3   : > { %1379 = vmatprep.subr.bf16.mxu1 %v1502_v8 }
 0x4c5   : > { %1370 = vmatmul.mubr.msk.bf16.vlgmr.msra.gmra.mrb[8].mxu1 %vm544_vm6, %v718_v25 }
 0x4c6   : > { %1380 = vmatpush3.bf16.msra.mxu1 %v817_v26  ;;  %1381 = vmatprep.mubr.msk.bf16.mxu1 %vm1503_vm1, %v1502_v8 }
 0x4c7   : > { %1391 = vmatprep.subr.bf16.mxu1 %v1502_v8 }
 0x524   : > { %v645_v27 = vpop.f32.mrb[4].mxu1 }
 0x525   : > { %v651_v28 = vpack.c.bf16 %v645_v27, %v645_v27  ;;  %v1359_v30 = vpop.f32.mrb[5].mxu1 }
 0x526   : > { %v648_v31 = vpop.f32.mrb[6].mxu1 }
 0x527   : > { %v1360_v32 = vpop.f32.mrb[7].mxu1  ;;  %1382 = vmatmul.mubr.msk.bf16.vlgmr.msra.gmra.mrb[12].mxu1 %vm544_vm6, %v651_v28 }
 0x528   : > { %1393 = vmatprep.mubr.msk.bf16.mxu1 %vm1503_vm1, %v1502_v8 }
 0x598   : > { %v759_v33 = vpop.f32.mrb[8].mxu1 }
 0x599   : > { %v765_v35 = vpack.c.bf16 %v759_v33, %v759_v33  ;;  %v1371_v36 = vpop.f32.mrb[9].mxu1 }
 0x59a   : > { %v762_v37 = vpop.f32.mrb[10].mxu1 }
 0x59b   : > { %v1372_v39 = vpop.f32.mrb[11].mxu1  ;;  %1376 = vmatmul.mubr.msk.bf16.vlgmr.msra.gmra.mrb[12].mxu0 %vm544_vm6, %v765_v35 }
 0x59c   : > { %1386 = vmatpush3.bf16.xpose.msra.mxu0 %v869_v40  ;;  %1387 = vmatprep.mubr.msk.bf16.mxu0 %vm1503_vm1, %v1502_v8  ;;  %v1131_v40 = vld [vmem:[%s1756_s6 + $0xc] sm:$0xf] }
 0x59d   : > { %1397 = vmatprep.subr.bf16.mxu0 %v1502_v8 }
 0x5a3   : > { %1388 = vmatmul.mubr.msk.bf16.vlgmr.msra.gmra.mrb[16].mxu0 %vm544_vm6, %v864_v41  ;;  %v1136_v41 = vsel %vm607_vm8, %v1131_v40, 0 }
 0x5a4   : > { %1399 = vmatprep.mubr.msk.bf16.mxu0 %vm1503_vm1, %v1502_v8  ;;  %1398 = vmatpush3.bf16.msra.mxu0 %v976_v12 }
 0x5a5   : > { %1409 = vmatprep.subr.bf16.mxu0 %v1502_v8 }
 0x5fa   : > { %v853_v42 = vpop.f32.mrb[12].mxu1 }
 0x5fb   : > { %v1383_v43 = vpop.f32.mrb[13].mxu1 }
 0x5fc   : > { %v856_v44 = vpop.f32.mrb[14].mxu1 }
 0x5fd   : > { %v1384_v45 = vpop.f32.mrb[15].mxu1 }
 0x66e   : > { %v807_v46 = vpop.f32.mrb[12].mxu0 }
 0x66f   : > { %v1691_v48 = vadd.f32 %v853_v42, %v807_v46  ;;  %v1377_v49 = vpop.f32.mrb[13].mxu0 }
 0x670   : > { %v810_v50 = vpop.f32.mrb[14].mxu0 }
 0x671   : > { %v1378_v51 = vpop.f32.mrb[15].mxu0 }
 0x676   : > { %v905_v52 = vpop.f32.mrb[16].mxu0 }
 0x677   : > { %v911_v53 = vsel %vm1641_vm7, -1e+09, %v905_v52  ;;  %v1389_v54 = vpop.f32.mrb[17].mxu0 }
 0x678   : > { %v908_v55 = vpop.f32.mrb[18].mxu0  ;;  %v912_v56 = vsel %vm544_vm6, %v911_v53, -inf }
 0x679   : > { %913 = vmax.xlane.f32.xlu0 %v912_v56  ;;  %v1390_v57 = vpop.f32.mrb[19].mxu0 }
 0x68f   : > { %454 = vrot.lane.b32.xlu0 %v1617_v29, %s1508_s15 }
 0x693   : > { %1023 = vrot.lane.b32.xlu0 %v1622_v38, %s1509_s16 }
 0x706   : > { %v914_v58 = vpop.xlane.xlu0 %913 }
 0x707   : > { %v915_v59 = vsub.f32 %v911_v53, %v914_v58 }
 0x709   : > { %v916_v60 = vmul.f32 1.442695, %v915_v59 }
 0x70a   : > { %v455_v61 = vpop.permute.xlu0 %454 }
 0x70b   : > { %1470 = vpow2.f32 %v916_v60  ;;  %458 = vst.msk [vmem:[#allocation4 + $0x8] sm:$0xf] %vm430_vm5, %v455_v61 }
 0x70e   : > { %v1024_v10 = vpop.permute.xlu0 %1023 }
 0x712   : > { %v862_v62 = vld [vmem:[#allocation4 + $0x8] sm:$0xf] }
 0x713   : > { %v928_v63 = vsel %vm607_vm8, %v862_v62, 0 }
 0x714   : > { %1392 = vmatpush3.bf16.msra.mxu1 %v928_v63 }
 0x715   : > { %v1471_v1 = vpop.eup %1470  ;;  %1403 = vmatprep.subr.bf16.mxu1 %v1502_v8 }
 0x716   : > { %v918_v2 = vsel %vm544_vm6, %v1471_v1, 0.0 }
 0x717   : > { %919 = vadd.xlane.f32.xlu1 %v918_v2 }
 0x728   : > { %459 = vrot.lane.b32.xlu1 %v1617_v29, %s1509_s16 }
 0x7a4   : > { %v920_v38 = vpop.xlane.xlu1 %919 }
 0x7a5   : > { %1472 = vrcp.f32 %v920_v38 }
 0x7a8   : > { %v460_v3 = vpop.permute.xlu1 %459 }
 0x7a9   : > { %463 = vst.msk [vmem:[#allocation3 + $0xc] sm:$0xf] %vm430_vm5, %v460_v3 }
 0x7af   : > { %v1473_v4 = vpop.eup %1472 }
 0x7b0   : > { %v922_v5 = vmul.f32 %v1473_v4, %v1471_v1  ;;  %v1020_v6 = vld [vmem:[#allocation3 + $0xc] sm:$0xf] }
 0x7b1   : > { %v1029_v9 = vsel %vm544_vm6, %v1020_v6, 0 }
 0x7b2   : > { %v923_v7 = vpack.c.bf16 %v922_v5, %v922_v5 }
 0x7b4   : > { %1394 = vmatmul.mubr.msk.bf16.vlgmr.msra.gmra.mrb[16].mxu1 %vm544_vm6, %v923_v7 }
 0x7b5   : > { %1404 = vmatpush3.bf16.xpose.msra.mxu1 %v1029_v9  ;;  %1405 = vmatprep.mubr.msk.bf16.mxu1 %vm1503_vm1, %v1502_v8 }
 0x7b6   : > { %1415 = vmatprep.subr.bf16.mxu1 %v1502_v8 }
 0x7bc   : > { %1406 = vmatmul.mubr.msk.bf16.vlgmr.msra.gmra.mrb[20].mxu1 %vm544_vm6, %v1024_v10 }
 0x7bd   : > { %1417 = vmatprep.mubr.msk.bf16.mxu1 %vm1503_vm1, %v1502_v8  ;;  %1416 = vmatpush3.bf16.msra.mxu1 %v1136_v41 }
 0x887   : > { %v964_v13 = vpop.f32.mrb[16].mxu1 }
 0x888   : > { %v970_v14 = vpack.c.bf16 %v964_v13, %v964_v13  ;;  %v1395_v15 = vpop.f32.mrb[17].mxu1 }
 0x889   : > { %v967_v16 = vpop.f32.mrb[18].mxu1 }
 0x88a   : > { %v1396_v17 = vpop.f32.mrb[19].mxu1  ;;  %1400 = vmatmul.mubr.msk.bf16.vlgmr.msra.gmra.mrb[20].mxu0 %vm544_vm6, %v970_v14 }
 0x88b   : > { %1411 = vmatprep.mubr.msk.bf16.mxu0 %vm1503_vm1, %v1502_v8 }
 0x88f   : > { %v1065_v18 = vpop.f32.mrb[20].mxu1 }
 0x890   : > { %v1071_v19 = vsel %vm1641_vm7, -1e+09, %v1065_v18  ;;  %v1407_v20 = vpop.f32.mrb[21].mxu1 }
 0x891   : > { %v1068_v21 = vpop.f32.mrb[22].mxu1  ;;  %v1072_v22 = vsel %vm544_vm6, %v1071_v19, -inf }
 0x892   : > { %1073 = vmax.xlane.f32.xlu0 %v1072_v22  ;;  %v1408_v23 = vpop.f32.mrb[23].mxu1 }
 0x8a8   : > { %464 = vrot.lane.b32.xlu0 %v1617_v29, %s1510_s19 }
 0x91f   : > { %v1074_v24 = vpop.xlane.xlu0 %1073 }
 0x920   : > { %v1075_v25 = vsub.f32 %v1071_v19, %v1074_v24 }
 0x922   : > { %v1076_v26 = vmul.f32 1.442695, %v1075_v25 }
 0x923   : > { %v465_v27 = vpop.permute.xlu0 %464 }
 0x924   : > { %1474 = vpow2.f32 %v1076_v26  ;;  %468 = vst.msk [vmem:[#allocation4 + $0xc] sm:$0xf] %vm430_vm5, %v465_v27 }
 0x92b   : > { %v1022_v8 = vld [vmem:[#allocation4 + $0xc] sm:$0xf] }
 0x92c   : > { %v1088_v47 = vsel %vm607_vm8, %v1022_v8, 0 }
 0x92d   : > { %1410 = vmatpush3.bf16.msra.mxu0 %v1088_v47 }
 0x92e   : > { %v1475_v28 = vpop.eup %1474 }
 0x92f   : > { %v1078_v30 = vsel %vm544_vm6, %v1475_v28, 0.0 }
 0x930   : > { %1079 = vadd.xlane.f32.xlu1 %v1078_v30 }
 0x95d   : > { %v1012_v31 = vpop.f32.mrb[20].mxu0 }
 0x95e   : > { %v1018_v32 = vadd.f32 %v1012_v31, %v1691_v48  ;;  %v1401_v33 = vpop.f32.mrb[21].mxu0 }
 0x95f   : > { %v1015_v29 = vpop.f32.mrb[22].mxu0 }
 0x960   : > { %v1402_v34 = vpop.f32.mrb[23].mxu0 }
 0x9bd   : > { %v1080_v35 = vpop.xlane.xlu1 %1079 }
 0x9be   : > { %1476 = vrcp.f32 %v1080_v35 }
 0x9c8   : > { %v1477_v36 = vpop.eup %1476 }
 0x9c9   : > { %v1082_v37 = vmul.f32 %v1477_v36, %v1475_v28 }
 0x9cb   : > { %v1083_v39 = vpack.c.bf16 %v1082_v37, %v1082_v37 }
 0x9cd   : > { %1412 = vmatmul.mubr.msk.bf16.vlgmr.msra.gmra.mrb[24].mxu0 %vm544_vm6, %v1083_v39 }
 0xaa0   : > { %v1124_v42 = vpop.f32.mrb[24].mxu0 }
 0xaa1   : > { %v1130_v43 = vpack.c.bf16 %v1124_v42, %v1124_v42  ;;  %v1413_v44 = vpop.f32.mrb[25].mxu0 }
 0xaa2   : > { %v1127_v45 = vpop.f32.mrb[26].mxu0 }
 0xaa3   : > { %v1414_v46 = vpop.f32.mrb[27].mxu0  ;;  %1418 = vmatmul.mubr.msk.bf16.vlgmr.msra.gmra.mrb[24].mxu1 %vm544_vm6, %v1130_v43 }
 0xb76   : > { %v1172_v48 = vpop.f32.mrb[24].mxu1 }
 0xb77   : > { %v1178_v49 = vadd.f32 %v1172_v48, %v1018_v32  ;;  %v1419_v50 = vpop.f32.mrb[25].mxu1 }
 0xb78   : > { %v1175_v51 = vpop.f32.mrb[26].mxu1 }
 0xb79   : > { %v1179_v52 = vadd.f32 %v1178_v49, %v1577_v0  ;;  %v1420_v53 = vpop.f32.mrb[27].mxu1 }
 0xb7b   : > { %1180 = vst.msk [vmem:[%s321_s29] sm:$0xff] %vm330_vm0, %v1179_v52 }
 0xb7c PF: > { %s17_s26 = sadd.s32 1, %s1500_s26   ;;  %s1760_s24 = smov %s1496_s25 }
 0xb7d   : > { %p14_p5 = scmp.ge.s32.totalorder %s17_s26, 4   ;;  %s1761_s25 = smov %s1763_s27 }
 0xb7f   :  { %16 = sbr.rel (!%p14_p5) target bundleno = 2 (0x2), region = 99 }

</bundles_post_ra>
